<compile_context>
chip_gen: v7x
topology: tpu7x:2x2x1
jax: 0.10.0
libtpu: 0.0.40
codegen_flags: <defaults>
</compile_context>

<pallas_src>
import jax
import jax.numpy as jnp
from jax.experimental import pallas as pl
from jax.experimental.pallas import tpu as pltpu

_LANE = 128
_SUB = 8


def _log_sigmoid(x):
    # log(sigmoid(x)) = min(x, 0) - log1p(exp(-|x|)).  log1p is computed with
    # the classic exact-correction trick (log(u) * t / (u - 1), u = 1 + t) so
    # we keep log1p-level accuracy while relying only on ops with guaranteed
    # Mosaic lowerings (exp, log, div, where).
    t = jnp.exp(-jnp.abs(x))
    u = 1.0 + t
    log1p_t = jnp.where(u == 1.0, t, jnp.log(u) * (t / (u - 1.0)))
    return jnp.minimum(x, 0.0) - log1p_t


def _sgns_kernel(idx_ref, aux_ref, in_tbl_ref, out_tbl_ref, partial_ref):
    """One batch tile: fused gather + fused pos/neg scoring + masked partial sum."""
    idx = idx_ref[...]          # (TR, 2) int32: [center_id, context_or_negative_id]
    aux = aux_ref[...]          # (TR, 2) f32  : [sign (+1 pos / -1 neg), valid]
    in_tbl = in_tbl_ref[...]    # (V, Dp) f32  : in_embed table, VMEM resident
    out_tbl = out_tbl_ref[...]  # (V, Dp) f32  : out_embed table, VMEM resident

    vocab = in_tbl.shape[0]
    tr = idx.shape[0]
    dp = in_tbl.shape[1]

    c_id = idx[:, 0:1]          # (TR, 1)
    o_id = idx[:, 1:2]          # (TR, 1)

    # In-kernel embedding gather for a small, VMEM-resident vocab: exact
    # select-and-accumulate over vocab rows (statically unrolled, O(V) VPU
    # work; exact in f32 because exactly one row is selected per output row).
    v_c = jnp.zeros((tr, dp), jnp.float32)
    v_o = jnp.zeros((tr, dp), jnp.float32)
    for v in range(vocab):
        v_c = v_c + jnp.where(c_id == v, in_tbl[v:v + 1, :], 0.0)
        v_o = v_o + jnp.where(o_id == v, out_tbl[v:v + 1, :], 0.0)

    # Fused positive+negative scoring: one lane-dense multiply, one lane
    # reduction, one log-sigmoid pass over all (1 pos + K neg) rows.
    score = jnp.sum(v_c * v_o, axis=1, keepdims=True)          # (TR, 1)
    terms = _log_sigmoid(score * aux[:, 0:1]) * aux[:, 1:2]    # sign + pad mask
    tile_sum = jnp.sum(terms)                                  # scalar

    # Lane-dense (1, 8, 128) partial-sum slab: tile_sum at [0, 0, 0], zeros
    # elsewhere -> full unmasked vector store.  Wrapper reduces the slabs.
    sub = jax.lax.broadcasted_iota(jnp.int32, (1, _SUB, _LANE), 1)
    lane = jax.lax.broadcasted_iota(jnp.int32, (1, _SUB, _LANE), 2)
    partial_ref[...] = jnp.where((sub == 0) & (lane == 0), tile_sum, 0.0)


def sgns_forward(in_embed, out_embed, center, context, negatives, *, tile_b=None):
    """Pallas implementation of SkipGramNegSampling.forward; returns scalar loss."""
    vocab, dim = in_embed.shape
    batch = center.shape[0]
    k_neg = negatives.shape[1]

    # Lane-dense embedding dim (zero padding; does not change any dot product).
    dp = ((dim + _LANE - 1) // _LANE) * _LANE
    in_tbl = jnp.pad(in_embed.astype(jnp.float32), ((0, 0), (0, dp - dim)))
    out_tbl = jnp.pad(out_embed.astype(jnp.float32), ((0, 0), (0, dp - dim)))

    # Batch tile (multiple of 8 sublanes).  512 rows is plenty to sit on the
    # HBM roofline; with fused gathers the per-tile VMEM footprint is tiny.
    if tile_b is None:
        tile_b = min(512, batch)
    tile_b = max(_SUB, ((tile_b + _SUB - 1) // _SUB) * _SUB)
    num_tiles = pl.cdiv(batch, tile_b)
    rows_per_ex = k_neg + 1                      # 1 positive + K negatives
    tile_rows = tile_b * rows_per_ex
    rows = batch * rows_per_ex
    rows_pad = num_tiles * tile_rows

    # Only tiny int32 indices (plus a sign/valid f32 pair) leave HBM; the float
    # embedding rows are gathered inside the kernel.
    center_rep = jnp.broadcast_to(center[:, None], (batch, rows_per_ex))
    other = jnp.concatenate([context[:, None], negatives], axis=1)     # (B, K+1)
    idx = jnp.stack([center_rep, other], axis=-1).astype(jnp.int32)
    idx = idx.reshape(rows, 2)
    sign = jnp.concatenate(
        [jnp.ones((batch, 1), jnp.float32),
         jnp.full((batch, k_neg), -1.0, jnp.float32)], axis=1).reshape(rows, 1)
    aux = jnp.concatenate([sign, jnp.ones((rows, 1), jnp.float32)], axis=1)
    idx = jnp.pad(idx, ((0, rows_pad - rows), (0, 0)))
    aux = jnp.pad(aux, ((0, rows_pad - rows), (0, 0)))   # padded rows: sign=valid=0

    partials = pl.pallas_call(
        _sgns_kernel,
        out_shape=jax.ShapeDtypeStruct((num_tiles, _SUB, _LANE), jnp.float32),
        grid=(num_tiles,),
        in_specs=[
            pl.BlockSpec((tile_rows, 2), lambda t: (t, 0)),
            pl.BlockSpec((tile_rows, 2), lambda t: (t, 0)),
            # Constant block index => table DMA'd once and kept VMEM-resident.
            pl.BlockSpec((vocab, dp), lambda t: (0, 0)),
            pl.BlockSpec((vocab, dp), lambda t: (0, 0)),
        ],
        out_specs=pl.BlockSpec((1, _SUB, _LANE), lambda t: (t, 0, 0)),
        compiler_params=pltpu.CompilerParams(
            dimension_semantics=("parallel",),   # megacore-shardable on v7x
        ),
    )(idx, aux, in_tbl, out_tbl)

    # loss = -(mean over batch of [logsig(pos) + sum_k logsig(-neg_k)])
    return -jnp.sum(partials) / batch


def sgns_reference(in_embed, out_embed, center, context, negatives):
    """Pure-JAX reference mirroring the PyTorch forward (elementwise math only,
    so XLA's default matmul precision cannot perturb the comparison)."""
    v_c = in_embed[center]
    v_o = out_embed[context]
    v_n = out_embed[negatives]
    pos = jnp.sum(v_c * v_o, axis=1)                            # (B,)
    neg = jnp.sum(-v_n * v_c[:, None, :], axis=2)               # (B, K)
    return -(jax.nn.log_sigmoid(pos)
             + jnp.sum(jax.nn.log_sigmoid(neg), axis=1)).mean()


if __name__ == "__main__":
    # Small shapes consistent with the module: dim = 20 (from the script), a
    # small synthetic vocab, a batch of (center, context) pairs, 5 negatives.
    vocab_size = 16
    dim = 20
    B = 8
    K = 5

    key = jax.random.PRNGKey(0)
    k_in, k_out, k_c, k_o, k_n = jax.random.split(key, 5)

    # nn.Embedding default init: N(0, 1)
    in_embed = jax.random.normal(k_in, (vocab_size, dim), dtype=jnp.float32)
    out_embed = jax.random.normal(k_out, (vocab_size, dim), dtype=jnp.float32)

    center = jax.random.randint(k_c, (B,), 0, vocab_size, dtype=jnp.int32)
    context = jax.random.randint(k_o, (B,), 0, vocab_size, dtype=jnp.int32)
    negatives = jax.random.randint(k_n, (B, K), 0, vocab_size, dtype=jnp.int32)

    loss = sgns_forward(in_embed, out_embed, center, context, negatives)
    jax.block_until_ready(loss)

    ref = sgns_reference(in_embed, out_embed, center, context, negatives)
    assert jnp.allclose(loss, ref, atol=1e-5, rtol=1e-5), (loss, ref)

    print("KERNEL_OK")
</pallas_src>

<mosaic_0001>
module attributes {stable_mosaic.version = 11 : i64} {
  func.func @_sgns_kernel(%arg0: i32, %arg1: memref<48x2xi32, #tpu.memory_space<vmem>>, %arg2: memref<48x2xf32, #tpu.memory_space<vmem>>, %arg3: memref<16x128xf32, #tpu.memory_space<vmem>>, %arg4: memref<16x128xf32, #tpu.memory_space<vmem>>, %arg5: memref<1x8x128xf32, #tpu.memory_space<vmem>>) attributes {dimension_semantics = [#tpu.dimension_semantics<parallel>], iteration_bounds = array<i64: 1>, scalar_prefetch = 0 : i64, scratch_operands = 0 : i64, tpu.core_type = #tpu.core_type<tc>, window_params = [{transform_indices = @transform_0, window_bounds = array<i64: 48, 2>}, {transform_indices = @transform_1, window_bounds = array<i64: 48, 2>}, {pipeline_mode = #tpu.pipeline_mode<synchronous>, transform_indices = @transform_2, window_bounds = array<i64: 16, 128>}, {pipeline_mode = #tpu.pipeline_mode<synchronous>, transform_indices = @transform_3, window_bounds = array<i64: 16, 128>}, {transform_indices = @transform_4, window_bounds = array<i64: 1, 8, 128>}]} {
    %c0 = arith.constant 0 : index
    %c0_0 = arith.constant 0 : index
    %0 = vector.load %arg1[%c0, %c0_0] : memref<48x2xi32, #tpu.memory_space<vmem>>, vector<48x2xi32>
    %c0_1 = arith.constant 0 : index
    %c0_2 = arith.constant 0 : index
    %1 = vector.load %arg2[%c0_1, %c0_2] : memref<48x2xf32, #tpu.memory_space<vmem>>, vector<48x2xf32>
    %c0_3 = arith.constant 0 : index
    %c0_4 = arith.constant 0 : index
    %2 = vector.load %arg3[%c0_3, %c0_4] : memref<16x128xf32, #tpu.memory_space<vmem>>, vector<16x128xf32>
    %c0_5 = arith.constant 0 : index
    %c0_6 = arith.constant 0 : index
    %3 = vector.load %arg4[%c0_5, %c0_6] : memref<16x128xf32, #tpu.memory_space<vmem>>, vector<16x128xf32>
    %4 = vector.extract_strided_slice %0 {offsets = [0, 0], sizes = [48, 1], strides = [1, 1]} : vector<48x2xi32> to vector<48x1xi32>
    %5 = vector.extract_strided_slice %0 {offsets = [0, 1], sizes = [48, 1], strides = [1, 1]} : vector<48x2xi32> to vector<48x1xi32>
    %cst = arith.constant 0.000000e+00 : f32
    %6 = vector.broadcast %cst : f32 to vector<48x128xf32>
    %cst_7 = arith.constant 0.000000e+00 : f32
    %7 = vector.broadcast %cst_7 : f32 to vector<48x128xf32>
    %c0_i32 = arith.constant 0 : i32
    %8 = vector.broadcast %c0_i32 : i32 to vector<48x1xi32>
    %9 = arith.cmpi eq, %4, %8 : vector<48x1xi32>
    %10 = vector.extract_strided_slice %2 {offsets = [0, 0], sizes = [1, 128], strides = [1, 1]} : vector<16x128xf32> to vector<1x128xf32>
    %cst_8 = arith.constant 0.000000e+00 : f32
    %11 = vector.shape_cast %9 : vector<48x1xi1> to vector<48x1xi1>
    %12 = vector.broadcast %11 : vector<48x1xi1> to vector<48x128xi1>
    %13 = vector.shape_cast %10 : vector<1x128xf32> to vector<1x128xf32>
    %14 = vector.broadcast %13 : vector<1x128xf32> to vector<48x128xf32>
    %15 = vector.broadcast %cst_8 : f32 to vector<48x128xf32>
    %16 = arith.select %12, %14, %15 : vector<48x128xi1>, vector<48x128xf32>
    %17 = arith.addf %6, %16 : vector<48x128xf32>
    %c0_i32_9 = arith.constant 0 : i32
    %18 = vector.broadcast %c0_i32_9 : i32 to vector<48x1xi32>
    %19 = arith.cmpi eq, %5, %18 : vector<48x1xi32>
    %20 = vector.extract_strided_slice %3 {offsets = [0, 0], sizes = [1, 128], strides = [1, 1]} : vector<16x128xf32> to vector<1x128xf32>
    %cst_10 = arith.constant 0.000000e+00 : f32
    %21 = vector.shape_cast %19 : vector<48x1xi1> to vector<48x1xi1>
    %22 = vector.broadcast %21 : vector<48x1xi1> to vector<48x128xi1>
    %23 = vector.shape_cast %20 : vector<1x128xf32> to vector<1x128xf32>
    %24 = vector.broadcast %23 : vector<1x128xf32> to vector<48x128xf32>
    %25 = vector.broadcast %cst_10 : f32 to vector<48x128xf32>
    %26 = arith.select %22, %24, %25 : vector<48x128xi1>, vector<48x128xf32>
    %27 = arith.addf %7, %26 : vector<48x128xf32>
    %c1_i32 = arith.constant 1 : i32
    %28 = vector.broadcast %c1_i32 : i32 to vector<48x1xi32>
    %29 = arith.cmpi eq, %4, %28 : vector<48x1xi32>
    %30 = vector.extract_strided_slice %2 {offsets = [1, 0], sizes = [1, 128], strides = [1, 1]} : vector<16x128xf32> to vector<1x128xf32>
    %cst_11 = arith.constant 0.000000e+00 : f32
    %31 = vector.shape_cast %29 : vector<48x1xi1> to vector<48x1xi1>
    %32 = vector.broadcast %31 : vector<48x1xi1> to vector<48x128xi1>
    %33 = vector.shape_cast %30 : vector<1x128xf32> to vector<1x128xf32>
    %34 = vector.broadcast %33 : vector<1x128xf32> to vector<48x128xf32>
    %35 = vector.broadcast %cst_11 : f32 to vector<48x128xf32>
    %36 = arith.select %32, %34, %35 : vector<48x128xi1>, vector<48x128xf32>
    %37 = arith.addf %17, %36 : vector<48x128xf32>
    %c1_i32_12 = arith.constant 1 : i32
    %38 = vector.broadcast %c1_i32_12 : i32 to vector<48x1xi32>
    %39 = arith.cmpi eq, %5, %38 : vector<48x1xi32>
    %40 = vector.extract_strided_slice %3 {offsets = [1, 0], sizes = [1, 128], strides = [1, 1]} : vector<16x128xf32> to vector<1x128xf32>
    %cst_13 = arith.constant 0.000000e+00 : f32
    %41 = vector.shape_cast %39 : vector<48x1xi1> to vector<48x1xi1>
    %42 = vector.broadcast %41 : vector<48x1xi1> to vector<48x128xi1>
    %43 = vector.shape_cast %40 : vector<1x128xf32> to vector<1x128xf32>
    %44 = vector.broadcast %43 : vector<1x128xf32> to vector<48x128xf32>
    %45 = vector.broadcast %cst_13 : f32 to vector<48x128xf32>
    %46 = arith.select %42, %44, %45 : vector<48x128xi1>, vector<48x128xf32>
    %47 = arith.addf %27, %46 : vector<48x128xf32>
    %c2_i32 = arith.constant 2 : i32
    %48 = vector.broadcast %c2_i32 : i32 to vector<48x1xi32>
    %49 = arith.cmpi eq, %4, %48 : vector<48x1xi32>
    %50 = vector.extract_strided_slice %2 {offsets = [2, 0], sizes = [1, 128], strides = [1, 1]} : vector<16x128xf32> to vector<1x128xf32>
    %cst_14 = arith.constant 0.000000e+00 : f32
    %51 = vector.shape_cast %49 : vector<48x1xi1> to vector<48x1xi1>
    %52 = vector.broadcast %51 : vector<48x1xi1> to vector<48x128xi1>
    %53 = vector.shape_cast %50 : vector<1x128xf32> to vector<1x128xf32>
    %54 = vector.broadcast %53 : vector<1x128xf32> to vector<48x128xf32>
    %55 = vector.broadcast %cst_14 : f32 to vector<48x128xf32>
    %56 = arith.select %52, %54, %55 : vector<48x128xi1>, vector<48x128xf32>
    %57 = arith.addf %37, %56 : vector<48x128xf32>
    %c2_i32_15 = arith.constant 2 : i32
    %58 = vector.broadcast %c2_i32_15 : i32 to vector<48x1xi32>
    %59 = arith.cmpi eq, %5, %58 : vector<48x1xi32>
    %60 = vector.extract_strided_slice %3 {offsets = [2, 0], sizes = [1, 128], strides = [1, 1]} : vector<16x128xf32> to vector<1x128xf32>
    %cst_16 = arith.constant 0.000000e+00 : f32
    %61 = vector.shape_cast %59 : vector<48x1xi1> to vector<48x1xi1>
    %62 = vector.broadcast %61 : vector<48x1xi1> to vector<48x128xi1>
    %63 = vector.shape_cast %60 : vector<1x128xf32> to vector<1x128xf32>
    %64 = vector.broadcast %63 : vector<1x128xf32> to vector<48x128xf32>
    %65 = vector.broadcast %cst_16 : f32 to vector<48x128xf32>
    %66 = arith.select %62, %64, %65 : vector<48x128xi1>, vector<48x128xf32>
    %67 = arith.addf %47, %66 : vector<48x128xf32>
    %c3_i32 = arith.constant 3 : i32
    %68 = vector.broadcast %c3_i32 : i32 to vector<48x1xi32>
    %69 = arith.cmpi eq, %4, %68 : vector<48x1xi32>
    %70 = vector.extract_strided_slice %2 {offsets = [3, 0], sizes = [1, 128], strides = [1, 1]} : vector<16x128xf32> to vector<1x128xf32>
    %cst_17 = arith.constant 0.000000e+00 : f32
    %71 = vector.shape_cast %69 : vector<48x1xi1> to vector<48x1xi1>
    %72 = vector.broadcast %71 : vector<48x1xi1> to vector<48x128xi1>
    %73 = vector.shape_cast %70 : vector<1x128xf32> to vector<1x128xf32>
    %74 = vector.broadcast %73 : vector<1x128xf32> to vector<48x128xf32>
    %75 = vector.broadcast %cst_17 : f32 to vector<48x128xf32>
    %76 = arith.select %72, %74, %75 : vector<48x128xi1>, vector<48x128xf32>
    %77 = arith.addf %57, %76 : vector<48x128xf32>
    %c3_i32_18 = arith.constant 3 : i32
    %78 = vector.broadcast %c3_i32_18 : i32 to vector<48x1xi32>
    %79 = arith.cmpi eq, %5, %78 : vector<48x1xi32>
    %80 = vector.extract_strided_slice %3 {offsets = [3, 0], sizes = [1, 128], strides = [1, 1]} : vector<16x128xf32> to vector<1x128xf32>
    %cst_19 = arith.constant 0.000000e+00 : f32
    %81 = vector.shape_cast %79 : vector<48x1xi1> to vector<48x1xi1>
    %82 = vector.broadcast %81 : vector<48x1xi1> to vector<48x128xi1>
    %83 = vector.shape_cast %80 : vector<1x128xf32> to vector<1x128xf32>
    %84 = vector.broadcast %83 : vector<1x128xf32> to vector<48x128xf32>
    %85 = vector.broadcast %cst_19 : f32 to vector<48x128xf32>
    %86 = arith.select %82, %84, %85 : vector<48x128xi1>, vector<48x128xf32>
    %87 = arith.addf %67, %86 : vector<48x128xf32>
    %c4_i32 = arith.constant 4 : i32
    %88 = vector.broadcast %c4_i32 : i32 to vector<48x1xi32>
    %89 = arith.cmpi eq, %4, %88 : vector<48x1xi32>
    %90 = vector.extract_strided_slice %2 {offsets = [4, 0], sizes = [1, 128], strides = [1, 1]} : vector<16x128xf32> to vector<1x128xf32>
    %cst_20 = arith.constant 0.000000e+00 : f32
    %91 = vector.shape_cast %89 : vector<48x1xi1> to vector<48x1xi1>
    %92 = vector.broadcast %91 : vector<48x1xi1> to vector<48x128xi1>
    %93 = vector.shape_cast %90 : vector<1x128xf32> to vector<1x128xf32>
    %94 = vector.broadcast %93 : vector<1x128xf32> to vector<48x128xf32>
    %95 = vector.broadcast %cst_20 : f32 to vector<48x128xf32>
    %96 = arith.select %92, %94, %95 : vector<48x128xi1>, vector<48x128xf32>
    %97 = arith.addf %77, %96 : vector<48x128xf32>
    %c4_i32_21 = arith.constant 4 : i32
    %98 = vector.broadcast %c4_i32_21 : i32 to vector<48x1xi32>
    %99 = arith.cmpi eq, %5, %98 : vector<48x1xi32>
    %100 = vector.extract_strided_slice %3 {offsets = [4, 0], sizes = [1, 128], strides = [1, 1]} : vector<16x128xf32> to vector<1x128xf32>
    %cst_22 = arith.constant 0.000000e+00 : f32
    %101 = vector.shape_cast %99 : vector<48x1xi1> to vector<48x1xi1>
    %102 = vector.broadcast %101 : vector<48x1xi1> to vector<48x128xi1>
    %103 = vector.shape_cast %100 : vector<1x128xf32> to vector<1x128xf32>
    %104 = vector.broadcast %103 : vector<1x128xf32> to vector<48x128xf32>
    %105 = vector.broadcast %cst_22 : f32 to vector<48x128xf32>
    %106 = arith.select %102, %104, %105 : vector<48x128xi1>, vector<48x128xf32>
    %107 = arith.addf %87, %106 : vector<48x128xf32>
    %c5_i32 = arith.constant 5 : i32
    %108 = vector.broadcast %c5_i32 : i32 to vector<48x1xi32>
    %109 = arith.cmpi eq, %4, %108 : vector<48x1xi32>
    %110 = vector.extract_strided_slice %2 {offsets = [5, 0], sizes = [1, 128], strides = [1, 1]} : vector<16x128xf32> to vector<1x128xf32>
    %cst_23 = arith.constant 0.000000e+00 : f32
    %111 = vector.shape_cast %109 : vector<48x1xi1> to vector<48x1xi1>
    %112 = vector.broadcast %111 : vector<48x1xi1> to vector<48x128xi1>
    %113 = vector.shape_cast %110 : vector<1x128xf32> to vector<1x128xf32>
    %114 = vector.broadcast %113 : vector<1x128xf32> to vector<48x128xf32>
    %115 = vector.broadcast %cst_23 : f32 to vector<48x128xf32>
    %116 = arith.select %112, %114, %115 : vector<48x128xi1>, vector<48x128xf32>
    %117 = arith.addf %97, %116 : vector<48x128xf32>
    %c5_i32_24 = arith.constant 5 : i32
    %118 = vector.broadcast %c5_i32_24 : i32 to vector<48x1xi32>
    %119 = arith.cmpi eq, %5, %118 : vector<48x1xi32>
    %120 = vector.extract_strided_slice %3 {offsets = [5, 0], sizes = [1, 128], strides = [1, 1]} : vector<16x128xf32> to vector<1x128xf32>
    %cst_25 = arith.constant 0.000000e+00 : f32
    %121 = vector.shape_cast %119 : vector<48x1xi1> to vector<48x1xi1>
    %122 = vector.broadcast %121 : vector<48x1xi1> to vector<48x128xi1>
    %123 = vector.shape_cast %120 : vector<1x128xf32> to vector<1x128xf32>
    %124 = vector.broadcast %123 : vector<1x128xf32> to vector<48x128xf32>
    %125 = vector.broadcast %cst_25 : f32 to vector<48x128xf32>
    %126 = arith.select %122, %124, %125 : vector<48x128xi1>, vector<48x128xf32>
    %127 = arith.addf %107, %126 : vector<48x128xf32>
    %c6_i32 = arith.constant 6 : i32
    %128 = vector.broadcast %c6_i32 : i32 to vector<48x1xi32>
    %129 = arith.cmpi eq, %4, %128 : vector<48x1xi32>
    %130 = vector.extract_strided_slice %2 {offsets = [6, 0], sizes = [1, 128], strides = [1, 1]} : vector<16x128xf32> to vector<1x128xf32>
    %cst_26 = arith.constant 0.000000e+00 : f32
    %131 = vector.shape_cast %129 : vector<48x1xi1> to vector<48x1xi1>
    %132 = vector.broadcast %131 : vector<48x1xi1> to vector<48x128xi1>
    %133 = vector.shape_cast %130 : vector<1x128xf32> to vector<1x128xf32>
    %134 = vector.broadcast %133 : vector<1x128xf32> to vector<48x128xf32>
    %135 = vector.broadcast %cst_26 : f32 to vector<48x128xf32>
    %136 = arith.select %132, %134, %135 : vector<48x128xi1>, vector<48x128xf32>
    %137 = arith.addf %117, %136 : vector<48x128xf32>
    %c6_i32_27 = arith.constant 6 : i32
    %138 = vector.broadcast %c6_i32_27 : i32 to vector<48x1xi32>
    %139 = arith.cmpi eq, %5, %138 : vector<48x1xi32>
    %140 = vector.extract_strided_slice %3 {offsets = [6, 0], sizes = [1, 128], strides = [1, 1]} : vector<16x128xf32> to vector<1x128xf32>
    %cst_28 = arith.constant 0.000000e+00 : f32
    %141 = vector.shape_cast %139 : vector<48x1xi1> to vector<48x1xi1>
    %142 = vector.broadcast %141 : vector<48x1xi1> to vector<48x128xi1>
    %143 = vector.shape_cast %140 : vector<1x128xf32> to vector<1x128xf32>
    %144 = vector.broadcast %143 : vector<1x128xf32> to vector<48x128xf32>
    %145 = vector.broadcast %cst_28 : f32 to vector<48x128xf32>
    %146 = arith.select %142, %144, %145 : vector<48x128xi1>, vector<48x128xf32>
    %147 = arith.addf %127, %146 : vector<48x128xf32>
    %c7_i32 = arith.constant 7 : i32
    %148 = vector.broadcast %c7_i32 : i32 to vector<48x1xi32>
    %149 = arith.cmpi eq, %4, %148 : vector<48x1xi32>
    %150 = vector.extract_strided_slice %2 {offsets = [7, 0], sizes = [1, 128], strides = [1, 1]} : vector<16x128xf32> to vector<1x128xf32>
    %cst_29 = arith.constant 0.000000e+00 : f32
    %151 = vector.shape_cast %149 : vector<48x1xi1> to vector<48x1xi1>
    %152 = vector.broadcast %151 : vector<48x1xi1> to vector<48x128xi1>
    %153 = vector.shape_cast %150 : vector<1x128xf32> to vector<1x128xf32>
    %154 = vector.broadcast %153 : vector<1x128xf32> to vector<48x128xf32>
    %155 = vector.broadcast %cst_29 : f32 to vector<48x128xf32>
    %156 = arith.select %152, %154, %155 : vector<48x128xi1>, vector<48x128xf32>
    %157 = arith.addf %137, %156 : vector<48x128xf32>
    %c7_i32_30 = arith.constant 7 : i32
    %158 = vector.broadcast %c7_i32_30 : i32 to vector<48x1xi32>
    %159 = arith.cmpi eq, %5, %158 : vector<48x1xi32>
    %160 = vector.extract_strided_slice %3 {offsets = [7, 0], sizes = [1, 128], strides = [1, 1]} : vector<16x128xf32> to vector<1x128xf32>
    %cst_31 = arith.constant 0.000000e+00 : f32
    %161 = vector.shape_cast %159 : vector<48x1xi1> to vector<48x1xi1>
    %162 = vector.broadcast %161 : vector<48x1xi1> to vector<48x128xi1>
    %163 = vector.shape_cast %160 : vector<1x128xf32> to vector<1x128xf32>
    %164 = vector.broadcast %163 : vector<1x128xf32> to vector<48x128xf32>
    %165 = vector.broadcast %cst_31 : f32 to vector<48x128xf32>
    %166 = arith.select %162, %164, %165 : vector<48x128xi1>, vector<48x128xf32>
    %167 = arith.addf %147, %166 : vector<48x128xf32>
    %c8_i32 = arith.constant 8 : i32
    %168 = vector.broadcast %c8_i32 : i32 to vector<48x1xi32>
    %169 = arith.cmpi eq, %4, %168 : vector<48x1xi32>
    %170 = vector.extract_strided_slice %2 {offsets = [8, 0], sizes = [1, 128], strides = [1, 1]} : vector<16x128xf32> to vector<1x128xf32>
    %cst_32 = arith.constant 0.000000e+00 : f32
    %171 = vector.shape_cast %169 : vector<48x1xi1> to vector<48x1xi1>
    %172 = vector.broadcast %171 : vector<48x1xi1> to vector<48x128xi1>
    %173 = vector.shape_cast %170 : vector<1x128xf32> to vector<1x128xf32>
    %174 = vector.broadcast %173 : vector<1x128xf32> to vector<48x128xf32>
    %175 = vector.broadcast %cst_32 : f32 to vector<48x128xf32>
    %176 = arith.select %172, %174, %175 : vector<48x128xi1>, vector<48x128xf32>
    %177 = arith.addf %157, %176 : vector<48x128xf32>
    %c8_i32_33 = arith.constant 8 : i32
    %178 = vector.broadcast %c8_i32_33 : i32 to vector<48x1xi32>
    %179 = arith.cmpi eq, %5, %178 : vector<48x1xi32>
    %180 = vector.extract_strided_slice %3 {offsets = [8, 0], sizes = [1, 128], strides = [1, 1]} : vector<16x128xf32> to vector<1x128xf32>
    %cst_34 = arith.constant 0.000000e+00 : f32
    %181 = vector.shape_cast %179 : vector<48x1xi1> to vector<48x1xi1>
    %182 = vector.broadcast %181 : vector<48x1xi1> to vector<48x128xi1>
    %183 = vector.shape_cast %180 : vector<1x128xf32> to vector<1x128xf32>
    %184 = vector.broadcast %183 : vector<1x128xf32> to vector<48x128xf32>
    %185 = vector.broadcast %cst_34 : f32 to vector<48x128xf32>
    %186 = arith.select %182, %184, %185 : vector<48x128xi1>, vector<48x128xf32>
    %187 = arith.addf %167, %186 : vector<48x128xf32>
    %c9_i32 = arith.constant 9 : i32
    %188 = vector.broadcast %c9_i32 : i32 to vector<48x1xi32>
    %189 = arith.cmpi eq, %4, %188 : vector<48x1xi32>
    %190 = vector.extract_strided_slice %2 {offsets = [9, 0], sizes = [1, 128], strides = [1, 1]} : vector<16x128xf32> to vector<1x128xf32>
    %cst_35 = arith.constant 0.000000e+00 : f32
    %191 = vector.shape_cast %189 : vector<48x1xi1> to vector<48x1xi1>
    %192 = vector.broadcast %191 : vector<48x1xi1> to vector<48x128xi1>
    %193 = vector.shape_cast %190 : vector<1x128xf32> to vector<1x128xf32>
    %194 = vector.broadcast %193 : vector<1x128xf32> to vector<48x128xf32>
    %195 = vector.broadcast %cst_35 : f32 to vector<48x128xf32>
    %196 = arith.select %192, %194, %195 : vector<48x128xi1>, vector<48x128xf32>
    %197 = arith.addf %177, %196 : vector<48x128xf32>
    %c9_i32_36 = arith.constant 9 : i32
    %198 = vector.broadcast %c9_i32_36 : i32 to vector<48x1xi32>
    %199 = arith.cmpi eq, %5, %198 : vector<48x1xi32>
    %200 = vector.extract_strided_slice %3 {offsets = [9, 0], sizes = [1, 128], strides = [1, 1]} : vector<16x128xf32> to vector<1x128xf32>
    %cst_37 = arith.constant 0.000000e+00 : f32
    %201 = vector.shape_cast %199 : vector<48x1xi1> to vector<48x1xi1>
    %202 = vector.broadcast %201 : vector<48x1xi1> to vector<48x128xi1>
    %203 = vector.shape_cast %200 : vector<1x128xf32> to vector<1x128xf32>
    %204 = vector.broadcast %203 : vector<1x128xf32> to vector<48x128xf32>
    %205 = vector.broadcast %cst_37 : f32 to vector<48x128xf32>
    %206 = arith.select %202, %204, %205 : vector<48x128xi1>, vector<48x128xf32>
    %207 = arith.addf %187, %206 : vector<48x128xf32>
    %c10_i32 = arith.constant 10 : i32
    %208 = vector.broadcast %c10_i32 : i32 to vector<48x1xi32>
    %209 = arith.cmpi eq, %4, %208 : vector<48x1xi32>
    %210 = vector.extract_strided_slice %2 {offsets = [10, 0], sizes = [1, 128], strides = [1, 1]} : vector<16x128xf32> to vector<1x128xf32>
    %cst_38 = arith.constant 0.000000e+00 : f32
    %211 = vector.shape_cast %209 : vector<48x1xi1> to vector<48x1xi1>
    %212 = vector.broadcast %211 : vector<48x1xi1> to vector<48x128xi1>
    %213 = vector.shape_cast %210 : vector<1x128xf32> to vector<1x128xf32>
    %214 = vector.broadcast %213 : vector<1x128xf32> to vector<48x128xf32>
    %215 = vector.broadcast %cst_38 : f32 to vector<48x128xf32>
    %216 = arith.select %212, %214, %215 : vector<48x128xi1>, vector<48x128xf32>
    %217 = arith.addf %197, %216 : vector<48x128xf32>
    %c10_i32_39 = arith.constant 10 : i32
    %218 = vector.broadcast %c10_i32_39 : i32 to vector<48x1xi32>
    %219 = arith.cmpi eq, %5, %218 : vector<48x1xi32>
    %220 = vector.extract_strided_slice %3 {offsets = [10, 0], sizes = [1, 128], strides = [1, 1]} : vector<16x128xf32> to vector<1x128xf32>
    %cst_40 = arith.constant 0.000000e+00 : f32
    %221 = vector.shape_cast %219 : vector<48x1xi1> to vector<48x1xi1>
    %222 = vector.broadcast %221 : vector<48x1xi1> to vector<48x128xi1>
    %223 = vector.shape_cast %220 : vector<1x128xf32> to vector<1x128xf32>
    %224 = vector.broadcast %223 : vector<1x128xf32> to vector<48x128xf32>
    %225 = vector.broadcast %cst_40 : f32 to vector<48x128xf32>
    %226 = arith.select %222, %224, %225 : vector<48x128xi1>, vector<48x128xf32>
    %227 = arith.addf %207, %226 : vector<48x128xf32>
    %c11_i32 = arith.constant 11 : i32
    %228 = vector.broadcast %c11_i32 : i32 to vector<48x1xi32>
    %229 = arith.cmpi eq, %4, %228 : vector<48x1xi32>
    %230 = vector.extract_strided_slice %2 {offsets = [11, 0], sizes = [1, 128], strides = [1, 1]} : vector<16x128xf32> to vector<1x128xf32>
    %cst_41 = arith.constant 0.000000e+00 : f32
    %231 = vector.shape_cast %229 : vector<48x1xi1> to vector<48x1xi1>
    %232 = vector.broadcast %231 : vector<48x1xi1> to vector<48x128xi1>
    %233 = vector.shape_cast %230 : vector<1x128xf32> to vector<1x128xf32>
    %234 = vector.broadcast %233 : vector<1x128xf32> to vector<48x128xf32>
    %235 = vector.broadcast %cst_41 : f32 to vector<48x128xf32>
    %236 = arith.select %232, %234, %235 : vector<48x128xi1>, vector<48x128xf32>
    %237 = arith.addf %217, %236 : vector<48x128xf32>
    %c11_i32_42 = arith.constant 11 : i32
    %238 = vector.broadcast %c11_i32_42 : i32 to vector<48x1xi32>
    %239 = arith.cmpi eq, %5, %238 : vector<48x1xi32>
    %240 = vector.extract_strided_slice %3 {offsets = [11, 0], sizes = [1, 128], strides = [1, 1]} : vector<16x128xf32> to vector<1x128xf32>
    %cst_43 = arith.constant 0.000000e+00 : f32
    %241 = vector.shape_cast %239 : vector<48x1xi1> to vector<48x1xi1>
    %242 = vector.broadcast %241 : vector<48x1xi1> to vector<48x128xi1>
    %243 = vector.shape_cast %240 : vector<1x128xf32> to vector<1x128xf32>
    %244 = vector.broadcast %243 : vector<1x128xf32> to vector<48x128xf32>
    %245 = vector.broadcast %cst_43 : f32 to vector<48x128xf32>
    %246 = arith.select %242, %244, %245 : vector<48x128xi1>, vector<48x128xf32>
    %247 = arith.addf %227, %246 : vector<48x128xf32>
    %c12_i32 = arith.constant 12 : i32
    %248 = vector.broadcast %c12_i32 : i32 to vector<48x1xi32>
    %249 = arith.cmpi eq, %4, %248 : vector<48x1xi32>
    %250 = vector.extract_strided_slice %2 {offsets = [12, 0], sizes = [1, 128], strides = [1, 1]} : vector<16x128xf32> to vector<1x128xf32>
    %cst_44 = arith.constant 0.000000e+00 : f32
    %251 = vector.shape_cast %249 : vector<48x1xi1> to vector<48x1xi1>
    %252 = vector.broadcast %251 : vector<48x1xi1> to vector<48x128xi1>
    %253 = vector.shape_cast %250 : vector<1x128xf32> to vector<1x128xf32>
    %254 = vector.broadcast %253 : vector<1x128xf32> to vector<48x128xf32>
    %255 = vector.broadcast %cst_44 : f32 to vector<48x128xf32>
    %256 = arith.select %252, %254, %255 : vector<48x128xi1>, vector<48x128xf32>
    %257 = arith.addf %237, %256 : vector<48x128xf32>
    %c12_i32_45 = arith.constant 12 : i32
    %258 = vector.broadcast %c12_i32_45 : i32 to vector<48x1xi32>
    %259 = arith.cmpi eq, %5, %258 : vector<48x1xi32>
    %260 = vector.extract_strided_slice %3 {offsets = [12, 0], sizes = [1, 128], strides = [1, 1]} : vector<16x128xf32> to vector<1x128xf32>
    %cst_46 = arith.constant 0.000000e+00 : f32
    %261 = vector.shape_cast %259 : vector<48x1xi1> to vector<48x1xi1>
    %262 = vector.broadcast %261 : vector<48x1xi1> to vector<48x128xi1>
    %263 = vector.shape_cast %260 : vector<1x128xf32> to vector<1x128xf32>
    %264 = vector.broadcast %263 : vector<1x128xf32> to vector<48x128xf32>
    %265 = vector.broadcast %cst_46 : f32 to vector<48x128xf32>
    %266 = arith.select %262, %264, %265 : vector<48x128xi1>, vector<48x128xf32>
    %267 = arith.addf %247, %266 : vector<48x128xf32>
    %c13_i32 = arith.constant 13 : i32
    %268 = vector.broadcast %c13_i32 : i32 to vector<48x1xi32>
    %269 = arith.cmpi eq, %4, %268 : vector<48x1xi32>
    %270 = vector.extract_strided_slice %2 {offsets = [13, 0], sizes = [1, 128], strides = [1, 1]} : vector<16x128xf32> to vector<1x128xf32>
    %cst_47 = arith.constant 0.000000e+00 : f32
    %271 = vector.shape_cast %269 : vector<48x1xi1> to vector<48x1xi1>
    %272 = vector.broadcast %271 : vector<48x1xi1> to vector<48x128xi1>
    %273 = vector.shape_cast %270 : vector<1x128xf32> to vector<1x128xf32>
    %274 = vector.broadcast %273 : vector<1x128xf32> to vector<48x128xf32>
    %275 = vector.broadcast %cst_47 : f32 to vector<48x128xf32>
    %276 = arith.select %272, %274, %275 : vector<48x128xi1>, vector<48x128xf32>
    %277 = arith.addf %257, %276 : vector<48x128xf32>
    %c13_i32_48 = arith.constant 13 : i32
    %278 = vector.broadcast %c13_i32_48 : i32 to vector<48x1xi32>
    %279 = arith.cmpi eq, %5, %278 : vector<48x1xi32>
    %280 = vector.extract_strided_slice %3 {offsets = [13, 0], sizes = [1, 128], strides = [1, 1]} : vector<16x128xf32> to vector<1x128xf32>
    %cst_49 = arith.constant 0.000000e+00 : f32
    %281 = vector.shape_cast %279 : vector<48x1xi1> to vector<48x1xi1>
    %282 = vector.broadcast %281 : vector<48x1xi1> to vector<48x128xi1>
    %283 = vector.shape_cast %280 : vector<1x128xf32> to vector<1x128xf32>
    %284 = vector.broadcast %283 : vector<1x128xf32> to vector<48x128xf32>
    %285 = vector.broadcast %cst_49 : f32 to vector<48x128xf32>
    %286 = arith.select %282, %284, %285 : vector<48x128xi1>, vector<48x128xf32>
    %287 = arith.addf %267, %286 : vector<48x128xf32>
    %c14_i32 = arith.constant 14 : i32
    %288 = vector.broadcast %c14_i32 : i32 to vector<48x1xi32>
    %289 = arith.cmpi eq, %4, %288 : vector<48x1xi32>
    %290 = vector.extract_strided_slice %2 {offsets = [14, 0], sizes = [1, 128], strides = [1, 1]} : vector<16x128xf32> to vector<1x128xf32>
    %cst_50 = arith.constant 0.000000e+00 : f32
    %291 = vector.shape_cast %289 : vector<48x1xi1> to vector<48x1xi1>
    %292 = vector.broadcast %291 : vector<48x1xi1> to vector<48x128xi1>
    %293 = vector.shape_cast %290 : vector<1x128xf32> to vector<1x128xf32>
    %294 = vector.broadcast %293 : vector<1x128xf32> to vector<48x128xf32>
    %295 = vector.broadcast %cst_50 : f32 to vector<48x128xf32>
    %296 = arith.select %292, %294, %295 : vector<48x128xi1>, vector<48x128xf32>
    %297 = arith.addf %277, %296 : vector<48x128xf32>
    %c14_i32_51 = arith.constant 14 : i32
    %298 = vector.broadcast %c14_i32_51 : i32 to vector<48x1xi32>
    %299 = arith.cmpi eq, %5, %298 : vector<48x1xi32>
    %300 = vector.extract_strided_slice %3 {offsets = [14, 0], sizes = [1, 128], strides = [1, 1]} : vector<16x128xf32> to vector<1x128xf32>
    %cst_52 = arith.constant 0.000000e+00 : f32
    %301 = vector.shape_cast %299 : vector<48x1xi1> to vector<48x1xi1>
    %302 = vector.broadcast %301 : vector<48x1xi1> to vector<48x128xi1>
    %303 = vector.shape_cast %300 : vector<1x128xf32> to vector<1x128xf32>
    %304 = vector.broadcast %303 : vector<1x128xf32> to vector<48x128xf32>
    %305 = vector.broadcast %cst_52 : f32 to vector<48x128xf32>
    %306 = arith.select %302, %304, %305 : vector<48x128xi1>, vector<48x128xf32>
    %307 = arith.addf %287, %306 : vector<48x128xf32>
    %c15_i32 = arith.constant 15 : i32
    %308 = vector.broadcast %c15_i32 : i32 to vector<48x1xi32>
    %309 = arith.cmpi eq, %4, %308 : vector<48x1xi32>
    %310 = vector.extract_strided_slice %2 {offsets = [15, 0], sizes = [1, 128], strides = [1, 1]} : vector<16x128xf32> to vector<1x128xf32>
    %cst_53 = arith.constant 0.000000e+00 : f32
    %311 = vector.shape_cast %309 : vector<48x1xi1> to vector<48x1xi1>
    %312 = vector.broadcast %311 : vector<48x1xi1> to vector<48x128xi1>
    %313 = vector.shape_cast %310 : vector<1x128xf32> to vector<1x128xf32>
    %314 = vector.broadcast %313 : vector<1x128xf32> to vector<48x128xf32>
    %315 = vector.broadcast %cst_53 : f32 to vector<48x128xf32>
    %316 = arith.select %312, %314, %315 : vector<48x128xi1>, vector<48x128xf32>
    %317 = arith.addf %297, %316 : vector<48x128xf32>
    %c15_i32_54 = arith.constant 15 : i32
    %318 = vector.broadcast %c15_i32_54 : i32 to vector<48x1xi32>
    %319 = arith.cmpi eq, %5, %318 : vector<48x1xi32>
    %320 = vector.extract_strided_slice %3 {offsets = [15, 0], sizes = [1, 128], strides = [1, 1]} : vector<16x128xf32> to vector<1x128xf32>
    %cst_55 = arith.constant 0.000000e+00 : f32
    %321 = vector.shape_cast %319 : vector<48x1xi1> to vector<48x1xi1>
    %322 = vector.broadcast %321 : vector<48x1xi1> to vector<48x128xi1>
    %323 = vector.shape_cast %320 : vector<1x128xf32> to vector<1x128xf32>
    %324 = vector.broadcast %323 : vector<1x128xf32> to vector<48x128xf32>
    %325 = vector.broadcast %cst_55 : f32 to vector<48x128xf32>
    %326 = arith.select %322, %324, %325 : vector<48x128xi1>, vector<48x128xf32>
    %327 = arith.addf %307, %326 : vector<48x128xf32>
    %328 = arith.mulf %317, %327 : vector<48x128xf32>
    %cst_56 = arith.constant dense<0.000000e+00> : vector<48xf32>
    %329 = vector.multi_reduction <add>, %328, %cst_56 [1] : vector<48x128xf32> to vector<48xf32>
    %330 = vector.shape_cast %329 : vector<48xf32> to vector<48x1xf32>
    %331 = vector.extract_strided_slice %1 {offsets = [0, 0], sizes = [48, 1], strides = [1, 1]} : vector<48x2xf32> to vector<48x1xf32>
    %332 = arith.mulf %330, %331 : vector<48x1xf32>
    %333 = math.absf %332 : vector<48x1xf32>
    %cst_57 = arith.constant 0.000000e+00 : f32
    %334 = vector.broadcast %cst_57 : f32 to vector<48x1xf32>
    %335 = arith.subf %334, %333 : vector<48x1xf32>
    %336 = math.exp %335 : vector<48x1xf32>
    %cst_58 = arith.constant 1.000000e+00 : f32
    %337 = vector.broadcast %cst_58 : f32 to vector<48x1xf32>
    %338 = arith.addf %337, %336 : vector<48x1xf32>
    %cst_59 = arith.constant 1.000000e+00 : f32
    %339 = vector.broadcast %cst_59 : f32 to vector<48x1xf32>
    %340 = arith.cmpf oeq, %338, %339 : vector<48x1xf32>
    %341 = math.log %338 : vector<48x1xf32>
    %cst_60 = arith.constant 1.000000e+00 : f32
    %342 = vector.broadcast %cst_60 : f32 to vector<48x1xf32>
    %343 = arith.subf %338, %342 : vector<48x1xf32>
    %344 = arith.divf %336, %343 : vector<48x1xf32>
    %345 = arith.mulf %341, %344 : vector<48x1xf32>
    %346 = arith.select %340, %336, %345 : vector<48x1xi1>, vector<48x1xf32>
    %cst_61 = arith.constant 0.000000e+00 : f32
    %347 = vector.broadcast %cst_61 : f32 to vector<48x1xf32>
    %348 = arith.minimumf %332, %347 : vector<48x1xf32>
    %349 = arith.subf %348, %346 : vector<48x1xf32>
    %350 = vector.extract_strided_slice %1 {offsets = [0, 1], sizes = [48, 1], strides = [1, 1]} : vector<48x2xf32> to vector<48x1xf32>
    %351 = arith.mulf %349, %350 : vector<48x1xf32>
    %352 = vector.shape_cast %351 : vector<48x1xf32> to vector<1x48x1xf32>
    %cst_62 = arith.constant dense<0.000000e+00> : vector<1xf32>
    %353 = vector.multi_reduction <add>, %352, %cst_62 [1, 2] : vector<1x48x1xf32> to vector<1xf32>
    %354 = vector.shape_cast %353 : vector<1xf32> to vector<1x1x1xf32>
    %355 = vector.extract %354[0, 0, 0] : f32 from vector<1x1x1xf32>
    %356 = tpu.iota {dimensions = array<i32: 1>} : vector<1x8x128xi32>
    %357 = tpu.iota {dimensions = array<i32: 2>} : vector<1x8x128xi32>
    %c0_i32_63 = arith.constant 0 : i32
    %358 = vector.broadcast %c0_i32_63 : i32 to vector<1x8x128xi32>
    %359 = arith.cmpi eq, %356, %358 : vector<1x8x128xi32>
    %c0_i32_64 = arith.constant 0 : i32
    %360 = vector.broadcast %c0_i32_64 : i32 to vector<1x8x128xi32>
    %361 = arith.cmpi eq, %357, %360 : vector<1x8x128xi32>
    %362 = arith.andi %359, %361 : vector<1x8x128xi1>
    %cst_65 = arith.constant 0.000000e+00 : f32
    %363 = vector.broadcast %355 : f32 to vector<1x8x128xf32>
    %364 = vector.broadcast %cst_65 : f32 to vector<1x8x128xf32>
    %365 = arith.select %362, %363, %364 : vector<1x8x128xi1>, vector<1x8x128xf32>
    %c0_66 = arith.constant 0 : index
    %c0_67 = arith.constant 0 : index
    %c0_68 = arith.constant 0 : index
    %366 = vector.load %arg5[%c0_66, %c0_67, %c0_68] : memref<1x8x128xf32, #tpu.memory_space<vmem>>, vector<1x8x128xf32>
    tpu.vector_store %arg5[%c0_66, %c0_67, %c0_68], %365 {strides = array<i32>} : memref<1x8x128xf32, #tpu.memory_space<vmem>>, vector<1x8x128xf32>,
    return
  }
  func.func @transform_0(%arg0: i32) -> (i32, i32) {
    %c0_i32 = arith.constant 0 : i32
    %c0_i32_0 = arith.constant 0 : i32
    return %arg0, %c0_i32 : i32, i32
  }
  func.func @transform_1(%arg0: i32) -> (i32, i32) {
    %c0_i32 = arith.constant 0 : i32
    %c0_i32_0 = arith.constant 0 : i32
    return %arg0, %c0_i32 : i32, i32
  }
  func.func @transform_2(%arg0: i32) -> (i32, i32) {
    %c0_i32 = arith.constant 0 : i32
    %c0_i32_0 = arith.constant 0 : i32
    %c0_i32_1 = arith.constant 0 : i32
    return %c0_i32, %c0_i32_0 : i32, i32
  }
  func.func @transform_3(%arg0: i32) -> (i32, i32) {
    %c0_i32 = arith.constant 0 : i32
    %c0_i32_0 = arith.constant 0 : i32
    %c0_i32_1 = arith.constant 0 : i32
    return %c0_i32, %c0_i32_0 : i32, i32
  }
  func.func @transform_4(%arg0: i32) -> (i32, i32, i32) {
    %c0_i32 = arith.constant 0 : i32
    %c0_i32_0 = arith.constant 0 : i32
    %c0_i32_1 = arith.constant 0 : i32
    return %arg0, %c0_i32, %c0_i32_0 : i32, i32, i32
  }
}

</mosaic_0001>

<bundles_post_ra>
// kernel: tpu_custom_call.1
= control target key start
LH: loop header
LB: loop body
LE: loop exit
PB: predicated region body
PF: predicated region fallthrough
CT: control target
= control target key end

     0   :  { %v3283_v3 = vmov 0   ;;  %s3273_s0 = inlined_call_operand.vmem [shape: s32[48,2], index: 0, kind: input, shape index: {}]   ;;  %s3274_s1 = inlined_call_operand.vmem [shape: f32[48,2], index: 1, kind: input, shape index: {}]   ;;  %s3275_s2 = inlined_call_operand.vmem [shape: f32[16,128], index: 2, kind: input, shape index: {}]   ;;  %s3276_s3 = inlined_call_operand.vmem [shape: f32[16,128], index: 3, kind: input, shape index: {}]   ;;  %s3277_s4 = inlined_call_operand.hbm [shape: f32[1,8,128], index: 4, kind: output, shape index: {}]  }
   0x1   :  { %v1840_v0 = vld [vmem:[%s3273_s0 + $0x10] sm:$0xff]  ;;  %v1845_v1 = vld [vmem:[%s3273_s0] sm:$0xff]  ;;  %v1850_v2 = vld [vmem:[%s3273_s0 + $0x18] sm:$0xff]  ;;  %1708 = vset.pattern.permute.xlu1 %v3283_v3  ;;  %1707 = vset.pattern.permute.xlu0 %v3283_v3 }
   0x2   :  { %vm36_vm0 = vcmp.eq.s32.totalorder %v1840_v0, 0  ;;  %vm34_vm1 = vcmp.eq.s32.totalorder %v1845_v1, 0  ;;  %vm37_vm2 = vcmp.eq.s32.totalorder %v1850_v2, 0  ;;  %v1860_v4 = vld [vmem:[%s3273_s0 + $0x8] sm:$0xff]  ;;  %v1875_v8 = vld [vmem:[%s3273_s0 + $0x20] sm:$0xff] }
   0x3   :  { %v42_v5 = vsel %vm36_vm0, 1, %v3283_v3  ;;  %v1864_v6 = vsel %vm34_vm1, 1, %v3283_v3  ;;  %vm35_vm3 = vcmp.eq.s32.totalorder %v1860_v4, 0  ;;  %v1870_v7 = vld [vmem:[%s3273_s0 + $0x28] sm:$0xff] }
   0x4   :  { %53 = vperm.xlu1 %1708, %v42_v5   ;;  %47 = vperm.xlu0 %1707, %v1864_v6  }
   0x5   :  { %9 = vsyncpa [#allocation3], 0  ;;  %v1879_v9 = vsel %vm37_vm2, 1, %v3283_v3  ;;  %v41_v10 = vsel %vm35_vm3, 1, %v3283_v3  ;;  %vm39_vm4 = vcmp.eq.s32.totalorder %v1870_v7, 0  ;;  %vm38_vm5 = vcmp.eq.s32.totalorder %v1875_v8, 0 }
   0x6   :  { %v1886_v11 = vsel %vm39_vm4, 1, %v3283_v3  ;;  %v44_v12 = vsel %vm38_vm5, 1, %v3283_v3  ;;  %vm127_vm6 = vcmp.eq.s32.totalorder %v1860_v4, 1  ;;  %vm130_vm7 = vcmp.eq.s32.totalorder %v1875_v8, 1  ;;  %s1810_s22 = smov 127  }
   0x7   :  { %v133_v13 = vsel %vm127_vm6, 1, %v3283_v3  ;;  %v3279_v14 = vmov 1   ;;  %v136_v15 = vsel %vm130_vm7, 1, %v3283_v3  ;;  %vm219_vm8 = vcmp.eq.s32.totalorder %v1860_v4, 2 }
   0x8   :  { %56 = vperm.xlu1 %1708, %v1879_v9   ;;  %50 = vperm.xlu0 %1707, %v41_v10   ;;  %v1897_v16 = vsel %vm219_vm8, 1, %v3283_v3  ;;  %vm222_vm9 = vcmp.eq.s32.totalorder %v1875_v8, 2  ;;  %vm126_vm10 = vcmp.eq.s32.totalorder %v1845_v1, 1  ;;  %vm311_vm11 = vcmp.eq.s32.totalorder %v1860_v4, 3 }
   0x9   :  { %v1903_v17 = vsel %vm222_vm9, 1, %v3283_v3  ;;  %v1907_v18 = vsel %vm126_vm10, 1, %v3283_v3  ;;  %vm128_vm12 = vcmp.eq.s32.totalorder %v1840_v0, 1  ;;  %v1913_v19 = vsel %vm311_vm11, 1, %v3283_v3 }
   0xa   :  { %vm314_vm13 = vcmp.eq.s32.totalorder %v1875_v8, 3  ;;  %v134_v20 = vsel %vm128_vm12, 1, %v3283_v3  ;;  %vm129_vm14 = vcmp.eq.s32.totalorder %v1850_v2, 1  ;;  %vm403_vm15 = vcmp.eq.s32.totalorder %v1860_v4, 4 }
   0xb   :  { %v1921_v21 = vsel %vm314_vm13, 1, %v3283_v3  ;;  %v1925_v22 = vsel %vm129_vm14, 1, %v3283_v3  ;;  %vm131_vm0 = vcmp.eq.s32.totalorder %v1870_v7, 1  ;;  %v1930_v23 = vsel %vm403_vm15, 1, %v3283_v3 }
   0xc   :  { %62 = vperm.xlu1 %1708, %v1886_v11   ;;  %59 = vperm.xlu0 %1707, %v44_v12   ;;  %vm406_vm1 = vcmp.eq.s32.totalorder %v1875_v8, 4  ;;  %v1935_v24 = vsel %vm131_vm0, 1, %v3283_v3  ;;  %vm495_vm2 = vcmp.eq.s32.totalorder %v1860_v4, 5  ;;  %vm498_vm3 = vcmp.eq.s32.totalorder %v1875_v8, 5 }
   0xd   :  { %v1939_v25 = vsel %vm406_vm1, 1, %v3283_v3  ;;  %v1945_v26 = vsel %vm495_vm2, 1, %v3283_v3  ;;  %v1951_v27 = vsel %vm498_vm3, 1, %v3283_v3  ;;  %vm587_vm4 = vcmp.eq.s32.totalorder %v1860_v4, 6 }
   0xe   :  { %v1956_v28 = vsel %vm587_vm4, 1, %v3283_v3  ;;  %vm218_vm5 = vcmp.eq.s32.totalorder %v1845_v1, 2  ;;  %vm590_vm6 = vcmp.eq.s32.totalorder %v1875_v8, 6  ;;  %vm220_vm7 = vcmp.eq.s32.totalorder %v1840_v0, 2 }
   0xf   :  { %v1962_v29 = vsel %vm218_vm5, 1, %v3283_v3  ;;  %v1965_v30 = vsel %vm590_vm6, 1, %v3283_v3  ;;  %vm679_vm8 = vcmp.eq.s32.totalorder %v1860_v4, 7  ;;  %v226_v31 = vsel %vm220_vm7, 1, %v3283_v3 }
  0x10   :  { %1709 = vset.pattern.permute.xlu1 %v3279_v14  ;;  %142 = vperm.xlu0 %1707, %v133_v13   ;;  %v1974_v32 = vsel %vm679_vm8, 1, %v3283_v3  ;;  %vm221_vm9 = vcmp.eq.s32.totalorder %v1850_v2, 2  ;;  %vm682_vm10 = vcmp.eq.s32.totalorder %v1875_v8, 7  ;;  %vm223_vm11 = vcmp.eq.s32.totalorder %v1870_v7, 2 }
  0x11   :  { %90 = vperm.xlu1 %1709, %v41_v10   ;;  %v1980_v33 = vsel %vm221_vm9, 1, %v3283_v3  ;;  %v1983_v34 = vsel %vm682_vm10, 1, %v3283_v3  ;;  %vm771_vm12 = vcmp.eq.s32.totalorder %v1860_v4, 8  ;;  %v1990_v35 = vsel %vm223_vm11, 1, %v3283_v3 }
  0x12   :  { %v1993_v36 = vsel %vm771_vm12, 1, %v3283_v3  ;;  %vm774_vm13 = vcmp.eq.s32.totalorder %v1875_v8, 8  ;;  %vm863_vm14 = vcmp.eq.s32.totalorder %v1860_v4, 9  ;;  %vm866_vm15 = vcmp.eq.s32.totalorder %v1875_v8, 9 }
  0x13   :  { %v1999_v37 = vsel %vm774_vm13, 1, %v3283_v3  ;;  %v2006_v38 = vsel %vm863_vm14, 1, %v3283_v3  ;;  %v2011_v39 = vsel %vm866_vm15, 1, %v3283_v3  ;;  %vm955_vm0 = vcmp.eq.s32.totalorder %v1860_v4, 10 }
  0x14   :  { %151 = vperm.xlu0 %1707, %v136_v15   ;;  %vm310_vm1 = vcmp.eq.s32.totalorder %v1845_v1, 3  ;;  %v2018_v40 = vsel %vm955_vm0, 1, %v3283_v3  ;;  %vm956_vm2 = vcmp.eq.s32.totalorder %v1840_v0, 10  ;;  %vm312_vm3 = vcmp.eq.s32.totalorder %v1840_v0, 3 }
  0x15   :  { %93 = vperm.xlu1 %1709, %v42_v5   ;;  %v2022_v41 = vsel %vm310_vm1, 1, %v3283_v3  ;;  %v2028_v42 = vsel %vm956_vm2, 1, %v3283_v3  ;;  %vm1046_vm4 = vcmp.eq.s32.totalorder %v1845_v1, 11  ;;  %v318_v43 = vsel %vm312_vm3, 1, %v3283_v3 }
  0x16   :  { %vm313_vm5 = vcmp.eq.s32.totalorder %v1850_v2, 3  ;;  %v2036_v44 = vsel %vm1046_vm4, 1, %v3283_v3  ;;  %vm1139_vm6 = vcmp.eq.s32.totalorder %v1860_v4, 12  ;;  %vm315_vm7 = vcmp.eq.s32.totalorder %v1870_v7, 3 }
  0x17   :  { %v2040_v45 = vsel %vm313_vm5, 1, %v3283_v3  ;;  %v2045_v46 = vsel %vm1139_vm6, 1, %v3283_v3  ;;  %vm958_vm8 = vcmp.eq.s32.totalorder %v1875_v8, 10  ;;  %v2050_v47 = vsel %vm315_vm7, 1, %v3283_v3 }
  0x18   :  { %234 = vperm.xlu0 %1707, %v1897_v16   ;;  %v2054_v48 = vsel %vm958_vm8, 1, %v3283_v3  ;;  %vm1049_vm9 = vcmp.eq.s32.totalorder %v1850_v2, 11  ;;  %vm1140_vm10 = vcmp.eq.s32.totalorder %v1840_v0, 12  ;;  %vm1230_vm11 = vcmp.eq.s32.totalorder %v1845_v1, 13 }
  0x19   :  { %99 = vperm.xlu1 %1709, %v44_v12   ;;  %v2060_v49 = vsel %vm1049_vm9, 1, %v3283_v3  ;;  %v2067_v50 = vsel %vm1140_vm10, 1, %v3283_v3  ;;  %v2072_v51 = vsel %vm1230_vm11, 1, %v3283_v3  ;;  %vm402_vm12 = vcmp.eq.s32.totalorder %v1845_v1, 4 }
  0x1a   :  { %vm1323_vm13 = vcmp.eq.s32.totalorder %v1860_v4, 14  ;;  %v2079_v52 = vsel %vm402_vm12, 1, %v3283_v3  ;;  %vm404_vm14 = vcmp.eq.s32.totalorder %v1840_v0, 4  ;;  %vm1051_vm15 = vcmp.eq.s32.totalorder %v1870_v7, 11 }
  0x1b   :  { %v2082_v53 = vsel %vm1323_vm13, 1, %v3283_v3  ;;  %v410_v54 = vsel %vm404_vm14, 1, %v3283_v3  ;;  %v2091_v55 = vsel %vm1051_vm15, 1, %v3283_v3  ;;  %vm405_vm0 = vcmp.eq.s32.totalorder %v1850_v2, 4 }
  0x1c   :  { %243 = vperm.xlu0 %1707, %v1903_v17   ;;  %vm1142_vm1 = vcmp.eq.s32.totalorder %v1875_v8, 12  ;;  %v2097_v56 = vsel %vm405_vm0, 1, %v3283_v3  ;;  %vm407_vm2 = vcmp.eq.s32.totalorder %v1870_v7, 4  ;;  %vm1233_vm3 = vcmp.eq.s32.totalorder %v1850_v2, 13 }
  0x1d   :  { %1710 = vset.pattern.permute.xlu1 %v3283_v3  ;;  %v2100_v57 = vsel %vm1142_vm1, 1, %v3283_v3  ;;  %v2107_v58 = vsel %vm407_vm2, 1, %v3283_v3  ;;  %v2110_v59 = vsel %vm1233_vm3, 1, %v3283_v3  ;;  %vm1324_vm4 = vcmp.eq.s32.totalorder %v1840_v0, 14 }
  0x1e   :  { %139 = vperm.xlu1 %1710, %v1907_v18   ;;  %v3278_v62 = vlaneseq  ;;  %v2120_v63 = vsel %vm1324_vm4, 1, %v3283_v3  ;;  %vm1414_vm5 = vcmp.eq.s32.totalorder %v1845_v1, 15  ;;  %vm494_vm7 = vcmp.eq.s32.totalorder %v1845_v1, 5 }
  0x1f   :  { %vm496_vm9 = vcmp.eq.s32.totalorder %v1840_v0, 5  ;;  %vm497_vm10 = vcmp.eq.s32.totalorder %v1850_v2, 5  ;;  %vm499_vm12 = vcmp.eq.s32.totalorder %v1870_v7, 5  ;;  %vm586_vm15 = vcmp.eq.s32.totalorder %v1845_v1, 6 }
  0x20   :  { %326 = vperm.xlu0 %1707, %v1913_v19   ;;  %v2130_v12 = vshrl.u32 %v3278_v62, 7  ;;  %vm588_vm0 = vcmp.eq.s32.totalorder %v1840_v0, 6  ;;  %vm589_vm1 = vcmp.eq.s32.totalorder %v1850_v2, 6  ;;  %vm591_vm2 = vcmp.eq.s32.totalorder %v1870_v7, 6 }
  0x21   :  { %vm678_vm4 = vcmp.eq.s32.totalorder %v1845_v1, 7 }
  0x22   :  { %145 = vperm.xlu1 %1710, %v134_v20   ;;  %3311 = vst [vmem:[#allocation9_spill] sm:$0xff] %v2130_v12 }
  0x24   :  { %335 = vperm.xlu0 %1707, %v1921_v21  }
  0x26   :  { %148 = vperm.xlu1 %1710, %v1925_v22  }
  0x28   :  { %418 = vperm.xlu0 %1707, %v1930_v23  }
  0x2a   :  { %154 = vperm.xlu1 %1710, %v1935_v24  }
  0x2c   :  { %427 = vperm.xlu0 %1707, %v1939_v25  }
  0x2e   :  { %1711 = vset.pattern.permute.xlu1 %v3279_v14 }
  0x2f   :  { %182 = vperm.xlu1 %1711, %v133_v13   ;;  %v2134_v13 = vsel %vm1414_vm5, 1, %v3283_v3  ;;  %vm680_vm5 = vcmp.eq.s32.totalorder %v1840_v0, 7 }
  0x30   :  { %510 = vperm.xlu0 %1707, %v1945_v26  }
  0x33   :  { %185 = vperm.xlu1 %1711, %v134_v20   ;;  %v2144_v20 = vsub.s32 1, %v2130_v12 }
  0x34   :  { %519 = vperm.xlu0 %1707, %v1951_v27  }
  0x37   :  { %191 = vperm.xlu1 %1711, %v136_v15  }
  0x38   :  { %602 = vperm.xlu0 %1707, %v1956_v28  }
  0x3b   :  { %1712 = vset.pattern.permute.xlu1 %v3283_v3 }
  0x3c   :  { %231 = vperm.xlu1 %1712, %v1962_v29   ;;  %611 = vperm.xlu0 %1707, %v1965_v30  }
  0x40   :  { %237 = vperm.xlu1 %1712, %v226_v31   ;;  %694 = vperm.xlu0 %1707, %v1974_v32  }
  0x44   :  { %240 = vperm.xlu1 %1712, %v1980_v33   ;;  %703 = vperm.xlu0 %1707, %v1983_v34  }
  0x48   :  { %246 = vperm.xlu1 %1712, %v1990_v35   ;;  %786 = vperm.xlu0 %1707, %v1993_v36  }
  0x4c   :  { %1713 = vset.pattern.permute.xlu1 %v3279_v14  ;;  %795 = vperm.xlu0 %1707, %v1999_v37  }
  0x4d   :  { %274 = vperm.xlu1 %1713, %v1897_v16  }
  0x50   :  { %878 = vperm.xlu0 %1707, %v2006_v38  }
  0x51   :  { %277 = vperm.xlu1 %1713, %v226_v31  }
  0x54   :  { %887 = vperm.xlu0 %1707, %v2011_v39  }
  0x55   :  { %283 = vperm.xlu1 %1713, %v1903_v17   ;;  %v2138_v17 = vsub.s32 0, %v2130_v12 }
  0x57   :  { %3312 = vst [vmem:[#allocation10_spill] sm:$0xff] %v2138_v17 }
  0x58   :  { %970 = vperm.xlu0 %1707, %v2018_v40  }
  0x59   :  { %1714 = vset.pattern.permute.xlu1 %v3283_v3 }
  0x5a   :  { %323 = vperm.xlu1 %1714, %v2022_v41  }
  0x5c   :  { %973 = vperm.xlu0 %1707, %v2028_v42  }
  0x5e   :  { %329 = vperm.xlu1 %1714, %v318_v43  }
  0x60   :  { %1059 = vperm.xlu0 %1707, %v2036_v44  }
  0x62   :  { %332 = vperm.xlu1 %1714, %v2040_v45  }
  0x64   :  { %1154 = vperm.xlu0 %1707, %v2045_v46  }
  0x66   :  { %338 = vperm.xlu1 %1714, %v2050_v47  }
  0x68   :  { %979 = vperm.xlu0 %1707, %v2054_v48  }
  0x6a   :  { %1715 = vset.pattern.permute.xlu1 %v3279_v14 }
  0x6b   :  { %366 = vperm.xlu1 %1715, %v1913_v19   ;;  %v30_v19 = vld [vmem:[%s3275_s2] sm:$0xff] }
  0x6c   :  { %1068 = vperm.xlu0 %1707, %v2060_v49   ;;  %v2153_v31 = vrot.slane %v30_v19, %v2138_v17 }
  0x6e   :  { %3314 = vst [vmem:[#allocation12_spill] sm:$0xff] %v2153_v31 }
  0x6f   :  { %369 = vperm.xlu1 %1715, %v318_v43  }
  0x70   :  { %1157 = vperm.xlu0 %1707, %v2067_v50  }
  0x73   :  { %375 = vperm.xlu1 %1715, %v1921_v21  }
  0x74   :  { %1243 = vperm.xlu0 %1707, %v2072_v51  }
  0x77   :  { %1716 = vset.pattern.permute.xlu1 %v3283_v3 }
  0x78   :  { %415 = vperm.xlu1 %1716, %v2079_v52   ;;  %1338 = vperm.xlu0 %1707, %v2082_v53  }
  0x7c   :  { %421 = vperm.xlu1 %1716, %v410_v54   ;;  %1074 = vperm.xlu0 %1707, %v2091_v55  }
  0x80   :  { %424 = vperm.xlu1 %1716, %v2097_v56   ;;  %1163 = vperm.xlu0 %1707, %v2100_v57  }
  0x83   :  { %v2113_v60 = vpop.permute.xlu1 %53  ;;  %v2115_v61 = vpop.permute.xlu0 %47 }
  0x84   :  { %3307 = vst [vmem:[#allocation5_spill] sm:$0xff] %v2113_v60  ;;  %3308 = vst [vmem:[#allocation6_spill] sm:$0xff] %v2115_v61  ;;  %430 = vperm.xlu1 %1716, %v2107_v58   ;;  %1252 = vperm.xlu0 %1707, %v2110_v59  }
  0x87   :  { %v2123_v5 = vpop.permute.xlu1 %56  ;;  %v2125_v10 = vpop.permute.xlu0 %50 }
  0x88   :  { %3309 = vst [vmem:[#allocation7_spill] sm:$0xff] %v2123_v5  ;;  %3310 = vst [vmem:[#allocation8_spill] sm:$0xff] %v2125_v10  ;;  %1717 = vset.pattern.permute.xlu1 %v3279_v14  ;;  %1341 = vperm.xlu0 %1707, %v2120_v63  }
  0x89   :  { %458 = vperm.xlu1 %1717, %v1930_v23  }
  0x8b   :  { %v63_v15 = vpop.permute.xlu1 %62  ;;  %v60_v16 = vpop.permute.xlu0 %59 }
  0x8c   :  { %1427 = vperm.xlu0 %1707, %v2134_v13   ;;  %vm68_vm6 = vcmp.eq.s32.totalorder %v60_v16, 1  ;;  %v2162_v16 = vsel %vm494_vm7, 1, %v3283_v3  ;;  %vm69_vm13 = vcmp.eq.s32.totalorder %v63_v15, 1  ;;  %vm683_vm7 = vcmp.eq.s32.totalorder %v1870_v7, 7 }
  0x8d   :  { %461 = vperm.xlu1 %1717, %v410_v54   ;;  %v78_v43 = vsel %vm68_vm6, %v2153_v31, 0.0  ;;  %v2159_v54 = vrot.slane %v30_v19, %v2144_v20  ;;  %vm681_vm6 = vcmp.eq.s32.totalorder %v1850_v2, 7 }
  0x8f   :  { %v2146_v21 = vpop.permute.xlu0 %142  ;;  %3315 = vst [vmem:[#allocation13_spill] sm:$0xff] %v2159_v54 }
  0x90   :  { %3313 = vst [vmem:[#allocation11_spill] sm:$0xff] %v2146_v21  ;;  %v2148_v23 = vpop.permute.xlu1 %90  ;;  %1738 = vset.pattern.permute.xlu0 %v3279_v14 }
  0x91   :  { %467 = vperm.xlu1 %1717, %v1939_v25   ;;  %87 = vperm.xlu0 %1738, %v1864_v6   ;;  %v2172_v25 = vsub.s32 2, %v2130_v12 }
  0x93   :  { %v152_v62 = vpop.permute.xlu0 %151  ;;  %v2182_v5 = vrot.slane %v30_v19, %v2172_v25  ;;  %v2198_v19 = vsel %vm499_vm12, 1, %v3283_v3  ;;  %vm862_vm12 = vcmp.eq.s32.totalorder %v1845_v1, 9 }
  0x94   :  { %vm160_vm8 = vcmp.eq.s32.totalorder %v152_v62, 1  ;;  %v2164_v14 = vpop.permute.xlu1 %93  ;;  %v502_v62 = vsel %vm496_vm9, 1, %v3283_v3  ;;  %vm772_vm9 = vcmp.eq.s32.totalorder %v1840_v0, 8 }
  0x95   :  { %3316 = vst [vmem:[#allocation14_spill] sm:$0xff] %v2164_v14  ;;  %v170_v60 = vsel %vm160_vm8, %v2159_v54, 0.0  ;;  %1718 = vset.pattern.permute.xlu1 %v3283_v3  ;;  %96 = vperm.xlu0 %1738, %v1879_v9   ;;  %3318 = vst [vmem:[#allocation16_spill] sm:$0xff] %v2182_v5  ;;  %vm770_vm8 = vcmp.eq.s32.totalorder %v1845_v1, 8 }
  0x96   :  { %v176_v6 = vadd.f32 %v170_v60, %v78_v43  ;;  %507 = vperm.xlu1 %1718, %v2162_v16   ;;  %v2185_v60 = vsel %vm497_vm10, 1, %v3283_v3  ;;  %vm773_vm10 = vcmp.eq.s32.totalorder %v1850_v2, 8 }
  0x97   :  { %v2174_v21 = vpop.permute.xlu0 %234 }
  0x98   :  { %3317 = vst [vmem:[#allocation15_spill] sm:$0xff] %v2174_v21  ;;  %v2177_v10 = vpop.permute.xlu1 %99 }
  0x99   :  { %102 = vperm.xlu0 %1738, %v1886_v11  }
  0x9a   :  { %513 = vperm.xlu1 %1718, %v502_v62  }
  0x9b   :  { %v244_v9 = vpop.permute.xlu0 %243 }
  0x9c   :  { %vm252_vm11 = vcmp.eq.s32.totalorder %v244_v9, 1 }
  0x9d   :  { %v262_v43 = vsel %vm252_vm11, %v2182_v5, 0.0  ;;  %v2189_v21 = vpop.permute.xlu1 %139  ;;  %179 = vperm.xlu0 %1738, %v1907_v18   ;;  %v3325_v18 = vmov 1   ;;  %vm775_vm11 = vcmp.eq.s32.totalorder %v1870_v7, 8 }
  0x9e   :  { %3319 = vst [vmem:[#allocation17_spill] sm:$0xff] %v2189_v21  ;;  %v2192_v61 = vadd.f32 %v262_v43, %v176_v6  ;;  %516 = vperm.xlu1 %1718, %v2185_v60  }
  0x9f   :  { %v2195_v11 = vpop.permute.xlu0 %326 }
  0xa0   :  { %3320 = vst [vmem:[#allocation18_spill] sm:$0xff] %v2192_v61  ;;  %3321 = vst [vmem:[#allocation19_spill] sm:$0xff] %v2195_v11 }
  0xa1   :  { %v2200_v14 = vpop.permute.xlu1 %145  ;;  %188 = vperm.xlu0 %1738, %v1925_v22   ;;  %v79_v22 = vsel %vm69_vm13, %v2153_v31, 0.0  ;;  %vm865_vm13 = vcmp.eq.s32.totalorder %v1850_v2, 9 }
  0xa2   :  { %3322 = vst [vmem:[#allocation20_spill] sm:$0xff] %v2200_v14  ;;  %522 = vperm.xlu1 %1718, %v2198_v19  }
  0xa3   :  { %v2204_v9 = vpop.permute.xlu0 %335 }
  0xa4   :  { %3323 = vst [vmem:[#allocation21_spill] sm:$0xff] %v2204_v9 }
  0xa5   :  { %v2206_v21 = vpop.permute.xlu1 %148  ;;  %194 = vperm.xlu0 %1738, %v1935_v24  }
  0xa6   :  { %3324 = vst [vmem:[#allocation22_spill] sm:$0xff] %v2206_v21  ;;  %1719 = vset.pattern.permute.xlu1 %v3325_v18 }
  0xa7   :  { %550 = vperm.xlu1 %1719, %v1945_v26   ;;  %v2211_v6 = vpop.permute.xlu0 %418 }
  0xa8   :  { %3326 = vst [vmem:[#allocation23_spill] sm:$0xff] %v2211_v6 }
  0xa9   :  { %v155_v43 = vpop.permute.xlu1 %154  ;;  %271 = vperm.xlu0 %1738, %v1962_v29   ;;  %v3329_v29 = vmov 0  }
  0xaa   :  { %vm161_vm14 = vcmp.eq.s32.totalorder %v155_v43, 1  ;;  %v592_v15 = vsel %vm586_vm15, 1, %v3329_v29  ;;  %vm957_vm15 = vcmp.eq.s32.totalorder %v1850_v2, 10 }
  0xab   :  { %v171_v3 = vsel %vm161_vm14, %v2159_v54, 0.0  ;;  %553 = vperm.xlu1 %1719, %v502_v62   ;;  %v2216_v14 = vpop.permute.xlu0 %427  ;;  %v595_v62 = vsel %vm589_vm1, 1, %v3329_v29  ;;  %vm867_vm14 = vcmp.eq.s32.totalorder %v1870_v7, 9  ;;  %vm864_vm1 = vcmp.eq.s32.totalorder %v1840_v0, 9 }
  0xac   :  { %3327 = vst [vmem:[#allocation24_spill] sm:$0xff] %v2216_v14  ;;  %v177_v11 = vadd.f32 %v171_v3, %v79_v22 }
  0xad   :  { %280 = vperm.xlu0 %1738, %v1980_v33   ;;  %v594_v33 = vsel %vm588_vm0, 1, %v3329_v29  ;;  %vm1048_vm0 = vcmp.eq.s32.totalorder %v1840_v0, 11 }
  0xae   :  { %v2219_v24 = vpop.permute.xlu1 %182 }
  0xaf   :  { %559 = vperm.xlu1 %1719, %v1951_v27   ;;  %v2223_v26 = vpop.permute.xlu0 %510 }
  0xb0   :  { %3328 = vst [vmem:[#allocation25_spill] sm:$0xff] %v2223_v26 }
  0xb1   :  { %286 = vperm.xlu0 %1738, %v1990_v35  }
  0xb2   :  { %v2227_v43 = vpop.permute.xlu1 %185 }
  0xb3   :  { %1720 = vset.pattern.permute.xlu1 %v3329_v29  ;;  %v2231_v3 = vpop.permute.xlu0 %519 }
  0xb4   :  { %3330 = vst [vmem:[#allocation26_spill] sm:$0xff] %v2231_v3  ;;  %599 = vperm.xlu1 %1720, %v592_v15  }
  0xb5   :  { %363 = vperm.xlu0 %1738, %v2022_v41   ;;  %v597_v41 = vsel %vm591_vm2, 1, %v3329_v29  ;;  %vm959_vm2 = vcmp.eq.s32.totalorder %v1870_v7, 10 }
  0xb6   :  { %v2235_v27 = vpop.permute.xlu1 %191 }
  0xb7   :  { %v2238_v35 = vpop.permute.xlu0 %602 }
  0xb8   :  { %3331 = vst [vmem:[#allocation27_spill] sm:$0xff] %v2238_v35  ;;  %605 = vperm.xlu1 %1720, %v594_v33  }
  0xb9   :  { %372 = vperm.xlu0 %1738, %v2040_v45  }
  0xbb   :  { %v2243_v22 = vpop.permute.xlu1 %231  ;;  %v2245_v26 = vpop.permute.xlu0 %611 }
  0xbc   :  { %3332 = vst [vmem:[#allocation28_spill] sm:$0xff] %v2243_v22  ;;  %3333 = vst [vmem:[#allocation29_spill] sm:$0xff] %v2245_v26  ;;  %608 = vperm.xlu1 %1720, %v595_v62  }
  0xbd   :  { %378 = vperm.xlu0 %1738, %v2050_v47  }
  0xbf   :  { %v2249_v6 = vpop.permute.xlu1 %237  ;;  %v2251_v54 = vpop.permute.xlu0 %694 }
  0xc0   :  { %3334 = vst [vmem:[#allocation30_spill] sm:$0xff] %v2249_v6  ;;  %3335 = vst [vmem:[#allocation31_spill] sm:$0xff] %v2251_v54  ;;  %614 = vperm.xlu1 %1720, %v597_v41  }
  0xc1   :  { %455 = vperm.xlu0 %1738, %v2079_v52  }
  0xc3   :  { %v2254_v45 = vpop.permute.xlu1 %240  ;;  %v2256_v35 = vpop.permute.xlu0 %703 }
  0xc4   :  { %3336 = vst [vmem:[#allocation32_spill] sm:$0xff] %v2254_v45  ;;  %3337 = vst [vmem:[#allocation33_spill] sm:$0xff] %v2256_v35  ;;  %1721 = vset.pattern.permute.xlu1 %v3325_v18 }
  0xc5   :  { %642 = vperm.xlu1 %1721, %v1956_v28   ;;  %464 = vperm.xlu0 %1738, %v2097_v56   ;;  %v684_v56 = vsel %vm678_vm4, 1, %v3329_v29  ;;  %vm1141_vm4 = vcmp.eq.s32.totalorder %v1850_v2, 12 }
  0xc7   :  { %v247_v47 = vpop.permute.xlu1 %246  ;;  %v2261_v22 = vpop.permute.xlu0 %786 }
  0xc8   :  { %3338 = vst [vmem:[#allocation34_spill] sm:$0xff] %v2261_v22  ;;  %vm253_vm3 = vcmp.eq.s32.totalorder %v247_v47, 1 }
  0xc9   :  { %v263_v6 = vsel %vm253_vm3, %v2182_v5, 0.0  ;;  %645 = vperm.xlu1 %1721, %v594_v33   ;;  %470 = vperm.xlu0 %1738, %v2107_v58   ;;  %vm1050_vm3 = vcmp.eq.s32.totalorder %v1875_v8, 11 }
  0xca   :  { %v2265_v52 = vadd.f32 %v263_v6, %v177_v11  ;;  %v686_v11 = vsel %vm680_vm5, 1, %v3329_v29  ;;  %v687_v6 = vsel %vm681_vm6, 1, %v3329_v29  ;;  %vm1232_vm5 = vcmp.eq.s32.totalorder %v1840_v0, 13 }
  0xcb   :  { %v2267_v54 = vpop.permute.xlu0 %795  ;;  %vm200_vm6 = vcmp.eq.s32.totalorder %v2235_v27, 1  ;;  %v2440_v27 = vsub.s32 3, %v2130_v12 }
  0xcc   :  { %3339 = vst [vmem:[#allocation35_spill] sm:$0xff] %v2265_v52  ;;  %3340 = vst [vmem:[#allocation36_spill] sm:$0xff] %v2267_v54  ;;  %v2269_v35 = vpop.permute.xlu1 %274 }
  0xcd   :  { %651 = vperm.xlu1 %1721, %v1965_v30   ;;  %547 = vperm.xlu0 %1738, %v2162_v16   ;;  %3369 = vst [vmem:[#allocation65_spill] sm:$0xff] %v2440_v27 }
  0xcf   :  { %v2274_v28 = vpop.permute.xlu0 %878 }
  0xd0   :  { %3341 = vst [vmem:[#allocation37_spill] sm:$0xff] %v2274_v28  ;;  %v2277_v47 = vpop.permute.xlu1 %277  ;;  %v689_v28 = vsel %vm683_vm7, 1, %v3329_v29  ;;  %vm108_vm7 = vcmp.eq.s32.totalorder %v2177_v10, 1 }
  0xd1   :  { %1722 = vset.pattern.permute.xlu1 %v3329_v29  ;;  %556 = vperm.xlu0 %1738, %v2185_v60  }
  0xd2   :  { %691 = vperm.xlu1 %1722, %v684_v56  }
  0xd3   :  { %v2282_v58 = vpop.permute.xlu0 %887 }
  0xd4   :  { %3342 = vst [vmem:[#allocation38_spill] sm:$0xff] %v2282_v58  ;;  %v2285_v30 = vpop.permute.xlu1 %283 }
  0xd5   :  { %562 = vperm.xlu0 %1738, %v2198_v19  }
  0xd6   :  { %697 = vperm.xlu1 %1722, %v686_v11  }
  0xd7   :  { %v2289_v16 = vpop.permute.xlu0 %970 }
  0xd8   :  { %3343 = vst [vmem:[#allocation39_spill] sm:$0xff] %v2289_v16 }
  0xd9   :  { %v2293_v33 = vpop.permute.xlu1 %323  ;;  %639 = vperm.xlu0 %1738, %v592_v15  }
  0xda   :  { %3344 = vst [vmem:[#allocation40_spill] sm:$0xff] %v2293_v33  ;;  %700 = vperm.xlu1 %1722, %v687_v6  }
  0xdb   :  { %v2295_v60 = vpop.permute.xlu0 %973 }
  0xdc   :  { %3345 = vst [vmem:[#allocation41_spill] sm:$0xff] %v2295_v60 }
  0xdd   :  { %v2298_v22 = vpop.permute.xlu1 %329  ;;  %648 = vperm.xlu0 %1738, %v595_v62  }
  0xde   :  { %3346 = vst [vmem:[#allocation42_spill] sm:$0xff] %v2298_v22  ;;  %706 = vperm.xlu1 %1722, %v689_v28  }
  0xdf   :  { %v2300_v19 = vpop.permute.xlu0 %1059 }
  0xe0   :  { %3347 = vst [vmem:[#allocation43_spill] sm:$0xff] %v2300_v19 }
  0xe1   :  { %v2302_v52 = vpop.permute.xlu1 %332  ;;  %654 = vperm.xlu0 %1738, %v597_v41  }
  0xe2   :  { %3348 = vst [vmem:[#allocation44_spill] sm:$0xff] %v2302_v52  ;;  %1723 = vset.pattern.permute.xlu1 %v3325_v18  ;;  %v2401_v52 = vsel %vm1050_vm3, 1, %v3329_v29 }
  0xe3   :  { %734 = vperm.xlu1 %1723, %v1974_v32   ;;  %v2306_v16 = vpop.permute.xlu0 %1154  ;;  %v776_v32 = vsel %vm770_vm8, 1, %v3329_v29  ;;  %vm292_vm8 = vcmp.eq.s32.totalorder %v2285_v30, 1  ;;  %v2450_v30 = vsub.s32 4, %v2130_v12 }
  0xe4   :  { %3349 = vst [vmem:[#allocation45_spill] sm:$0xff] %v2306_v16  ;;  %v781_v16 = vsel %vm775_vm11, 1, %v3329_v29  ;;  %vm1143_vm11 = vcmp.eq.s32.totalorder %v1870_v7, 12 }
  0xe5   :  { %v2308_v15 = vpop.permute.xlu1 %338  ;;  %731 = vperm.xlu0 %1738, %v684_v56   ;;  %3370 = vst [vmem:[#allocation66_spill] sm:$0xff] %v2450_v30  ;;  %v2473_v14 = vsel %vm1143_vm11, 1, %v3329_v29  ;;  %vm1235_vm11 = vcmp.eq.s32.totalorder %v1870_v7, 13 }
  0xe6   :  { %3350 = vst [vmem:[#allocation46_spill] sm:$0xff] %v2308_v15  ;;  %v2417_v15 = vsel %vm1232_vm5, 1, %v3329_v29 }
  0xe7   :  { %737 = vperm.xlu1 %1723, %v686_v11   ;;  %v2310_v60 = vpop.permute.xlu0 %979  ;;  %v778_v11 = vsel %vm772_vm9, 1, %v3329_v29  ;;  %vm954_vm9 = vcmp.eq.s32.totalorder %v1845_v1, 10 }
  0xe8   :  { %3351 = vst [vmem:[#allocation47_spill] sm:$0xff] %v2310_v60  ;;  %v960_v21 = vsel %vm954_vm9, 1, %v3329_v29 }
  0xe9   :  { %740 = vperm.xlu0 %1738, %v687_v6  }
  0xea   :  { %v2312_v62 = vpop.permute.xlu1 %366 }
  0xeb   :  { %743 = vperm.xlu1 %1723, %v1983_v34   ;;  %v2316_v41 = vpop.permute.xlu0 %1068 }
  0xec   :  { %3352 = vst [vmem:[#allocation48_spill] sm:$0xff] %v2316_v41 }
  0xed   :  { %746 = vperm.xlu0 %1738, %v689_v28   ;;  %v779_v28 = vsel %vm773_vm10, 1, %v3329_v29 }
  0xee   :  { %v2319_v22 = vpop.permute.xlu1 %369 }
  0xef   :  { %1724 = vset.pattern.permute.xlu1 %v3329_v29  ;;  %v2323_v56 = vpop.permute.xlu0 %1157 }
  0xf0   :  { %3353 = vst [vmem:[#allocation49_spill] sm:$0xff] %v2323_v56  ;;  %783 = vperm.xlu1 %1724, %v776_v32  }
  0xf1   :  { %823 = vperm.xlu0 %1738, %v776_v32   ;;  %v868_v32 = vsel %vm862_vm12, 1, %v3329_v29 }
  0xf2   :  { %v2327_v34 = vpop.permute.xlu1 %375 }
  0xf3   :  { %v2330_v6 = vpop.permute.xlu0 %1243  ;;  %vm384_vm10 = vcmp.eq.s32.totalorder %v2327_v34, 1 }
  0xf4   :  { %3354 = vst [vmem:[#allocation50_spill] sm:$0xff] %v2330_v6  ;;  %789 = vperm.xlu1 %1724, %v778_v11   ;;  %v871_v6 = vsel %vm865_vm13, 1, %v3329_v29 }
  0xf5   :  { %832 = vperm.xlu0 %1738, %v779_v28  }
  0xf7   :  { %v2334_v19 = vpop.permute.xlu1 %415  ;;  %v2336_v56 = vpop.permute.xlu0 %1338 }
  0xf8   :  { %3355 = vst [vmem:[#allocation51_spill] sm:$0xff] %v2334_v19  ;;  %3356 = vst [vmem:[#allocation52_spill] sm:$0xff] %v2336_v56  ;;  %792 = vperm.xlu1 %1724, %v779_v28   ;;  %v873_v28 = vsel %vm867_vm14, 1, %v3329_v29 }
  0xf9   :  { %838 = vperm.xlu0 %1738, %v781_v16  }
  0xfb   :  { %v2340_v41 = vpop.permute.xlu1 %421  ;;  %v2342_v60 = vpop.permute.xlu0 %1074 }
  0xfc   :  { %3357 = vst [vmem:[#allocation53_spill] sm:$0xff] %v2340_v41  ;;  %3358 = vst [vmem:[#allocation54_spill] sm:$0xff] %v2342_v60  ;;  %798 = vperm.xlu1 %1724, %v781_v16  }
  0xfd   :  { %915 = vperm.xlu0 %1738, %v868_v32  }
  0xff   :  { %v2346_v33 = vpop.permute.xlu1 %424  ;;  %v2348_v19 = vpop.permute.xlu0 %1163 }
 0x100   :  { %3359 = vst [vmem:[#allocation55_spill] sm:$0xff] %v2346_v33  ;;  %3360 = vst [vmem:[#allocation56_spill] sm:$0xff] %v2348_v19  ;;  %1725 = vset.pattern.permute.xlu1 %v3325_v18 }
 0x101   :  { %826 = vperm.xlu1 %1725, %v1993_v36   ;;  %924 = vperm.xlu0 %1738, %v871_v6   ;;  %v2366_v36 = vsel %vm957_vm15, 1, %v3329_v29  ;;  %vm1234_vm15 = vcmp.eq.s32.totalorder %v1875_v8, 13 }
 0x103   :  { %v2354_v60 = vpop.permute.xlu1 %430  ;;  %v2356_v56 = vpop.permute.xlu0 %1252 }
 0x104   :  { %3361 = vst [vmem:[#allocation57_spill] sm:$0xff] %v2354_v60  ;;  %3362 = vst [vmem:[#allocation58_spill] sm:$0xff] %v2356_v56 }
 0x105   :  { %829 = vperm.xlu1 %1725, %v778_v11   ;;  %930 = vperm.xlu0 %1738, %v873_v28  }
 0x107   :  { %v2358_v16 = vpop.permute.xlu0 %1341 }
 0x108   :  { %3363 = vst [vmem:[#allocation59_spill] sm:$0xff] %v2358_v16  ;;  %v2361_v19 = vpop.permute.xlu1 %458 }
 0x109   :  { %835 = vperm.xlu1 %1725, %v1999_v37   ;;  %1099 = vperm.xlu0 %1738, %v2036_v44   ;;  %v2377_v37 = vsel %vm1048_vm0, 1, %v3329_v29  ;;  %v870_v44 = vsel %vm864_vm1, 1, %v3329_v29 }
 0x10b   :  { %v2368_v41 = vpop.permute.xlu0 %1427 }
 0x10c   :  { %3364 = vst [vmem:[#allocation60_spill] sm:$0xff] %v2368_v41  ;;  %v2371_v56 = vpop.permute.xlu1 %461 }
 0x10d   :  { %1726 = vset.pattern.permute.xlu1 %v3329_v29  ;;  %1016 = vperm.xlu0 %1738, %v2366_v36  }
 0x10e   :  { %875 = vperm.xlu1 %1726, %v868_v32   ;;  %v2392_v32 = vsel %vm959_vm2, 1, %v3329_v29 }
 0x110   :  { %v2380_v11 = vpop.permute.xlu1 %467  ;;  %v2382_v16 = vpop.permute.xlu0 %87 }
 0x111   :  { %1105 = vperm.xlu0 %1738, %v2377_v37   ;;  %vm476_vm12 = vcmp.eq.s32.totalorder %v2380_v11, 1  ;;  %vm104_vm13 = vcmp.eq.s32.totalorder %v2382_v16, 1 }
 0x112   :  { %881 = vperm.xlu1 %1726, %v870_v44  }
 0x114   :  { %v2386_v41 = vpop.permute.xlu0 %96 }
 0x115   :  { %v2388_v33 = vpop.permute.xlu1 %507  ;;  %1283 = vperm.xlu0 %1738, %v2072_v51   ;;  %vm107_vm0 = vcmp.eq.s32.totalorder %v2386_v41, 1 }
 0x116   :  { %3365 = vst [vmem:[#allocation61_spill] sm:$0xff] %v2388_v33  ;;  %884 = vperm.xlu1 %1726, %v871_v6   ;;  %v2409_v6 = vsel %vm1141_vm4, 1, %v3329_v29  ;;  %vm1325_vm4 = vcmp.eq.s32.totalorder %v1850_v2, 14 }
 0x117   :  { %v2504_v2 = vsel %vm1325_vm4, 1, %v3329_v29 }
 0x118   :  { %v2395_v60 = vpop.permute.xlu0 %102 }
 0x119   :  { %v2397_v58 = vpop.permute.xlu1 %513  ;;  %1022 = vperm.xlu0 %1738, %v2392_v32   ;;  %vm109_vm5 = vcmp.eq.s32.totalorder %v2395_v60, 1 }
 0x11a   :  { %3366 = vst [vmem:[#allocation62_spill] sm:$0xff] %v2397_v58  ;;  %890 = vperm.xlu1 %1726, %v873_v28  }
 0x11c   :  { %v180_v33 = vpop.permute.xlu0 %179 }
 0x11d   :  { %v2404_v51 = vpop.permute.xlu1 %516  ;;  %1111 = vperm.xlu0 %1738, %v2401_v52   ;;  %vm196_vm14 = vcmp.eq.s32.totalorder %v180_v33, 1  ;;  %v2478_v33 = vsub.s32 5, %v2130_v12 }
 0x11e   :  { %3367 = vst [vmem:[#allocation63_spill] sm:$0xff] %v2404_v51  ;;  %1727 = vset.pattern.permute.xlu1 %v3325_v18  ;;  %v2422_v51 = vld [vmem:[%s3276_s3] sm:$0xff] }
 0x11f   :  { %918 = vperm.xlu1 %1727, %v2006_v38   ;;  %v2427_v38 = vrot.slane %v2422_v51, %v2144_v20  ;;  %v2445_v5 = vrot.slane %v2422_v51, %v2172_v25  ;;  %v2459_v31 = vrot.slane %v2422_v51, %v2440_v27  ;;  %v2468_v34 = vrot.slane %v2422_v51, %v2450_v30 }
 0x120   :  { %v189_v28 = vpop.permute.xlu0 %188  ;;  %3371 = vst [vmem:[#allocation67_spill] sm:$0xff] %v2478_v33  ;;  %v2487_v8 = vrot.slane %v2422_v51, %v2478_v33 }
 0x121   :  { %v2413_v58 = vpop.permute.xlu1 %522  ;;  %1200 = vperm.xlu0 %1738, %v2409_v6   ;;  %v302_v45 = vsel %vm292_vm8, %v2445_v5, 0.0  ;;  %v206_v11 = vsel %vm196_vm14, %v2427_v38, 0.0  ;;  %vm199_vm1 = vcmp.eq.s32.totalorder %v189_v28, 1  ;;  %vm1416_vm8 = vcmp.eq.s32.totalorder %v1840_v0, 15 }
 0x122   :  { %3368 = vst [vmem:[#allocation64_spill] sm:$0xff] %v2413_v58  ;;  %v2437_v58 = vrot.slane %v2422_v51, %v2138_v17  ;;  %v209_v41 = vsel %vm199_vm1, %v2427_v38, 0.0 }
 0x123   :  { %921 = vperm.xlu1 %1727, %v870_v44   ;;  %v210_v44 = vsel %vm200_vm6, %v2427_v38, 0.0 }
 0x124   :  { %v2429_v54 = vpop.permute.xlu0 %194  ;;  %v118_v1 = vsel %vm108_vm7, %v2437_v58, 0.0  ;;  %v114_v16 = vsel %vm104_vm13, %v2437_v58, 0.0 }
 0x125   :  { %1289 = vperm.xlu0 %1738, %v2417_v15   ;;  %v216_v3 = vadd.f32 %v210_v44, %v118_v1  ;;  %v212_v27 = vadd.f32 %v206_v11, %v114_v16  ;;  %vm201_vm6 = vcmp.eq.s32.totalorder %v2429_v54, 1 }
 0x126   :  { %v2447_v10 = vpop.permute.xlu1 %550  ;;  %v211_v60 = vsel %vm201_vm6, %v2427_v38, 0.0 }
 0x127   :  { %927 = vperm.xlu1 %1727, %v2011_v39   ;;  %v394_v39 = vsel %vm384_vm10, %v2459_v31, 0.0  ;;  %v308_v9 = vadd.f32 %v302_v45, %v216_v3  ;;  %v2490_v45 = vsel %vm1234_vm15, 1, %v3329_v29 }
 0x128   :  { %v272_v26 = vpop.permute.xlu0 %271 }
 0x129   :  { %1467 = vperm.xlu0 %1738, %v2134_v13   ;;  %v486_v13 = vsel %vm476_vm12, %v2468_v34, 0.0  ;;  %v400_v1 = vadd.f32 %v394_v39, %v308_v9  ;;  %vm288_vm2 = vcmp.eq.s32.totalorder %v272_v26, 1  ;;  %v117_v9 = vsel %vm107_vm0, %v2437_v58, 0.0 }
 0x12a   :  { %v2470_v61 = vpop.permute.xlu1 %553  ;;  %v298_v26 = vsel %vm288_vm2, %v2445_v5, 0.0  ;;  %v215_v16 = vadd.f32 %v209_v41, %v117_v9  ;;  %vm1047_vm12 = vcmp.eq.s32.totalorder %v1860_v4, 11  ;;  %v1778_v4 = vld [vmem:[%s3273_s0 + $0x20] sm:$0xff] }
 0x12b   :  { %1728 = vset.pattern.permute.xlu1 %v3329_v29  ;;  %v492_v30 = vadd.f32 %v486_v13, %v400_v1  ;;  %v304_v11 = vadd.f32 %v298_v26, %v212_v27  ;;  %v2516_v27 = vsel %vm1416_vm8, 1, %v3329_v29  ;;  %v1053_v7 = vsel %vm1047_vm12, 1, %v3329_v29 }
 0x12c   :  { %967 = vperm.xlu1 %1728, %v960_v21   ;;  %v281_v44 = vpop.permute.xlu0 %280  ;;  %vm1326_vm14 = vcmp.eq.s32.totalorder %v1778_v4, 14  ;;  %vm1418_vm4 = vcmp.eq.s32.totalorder %v1778_v4, 15 }
 0x12d   :  { %1206 = vperm.xlu0 %1738, %v2473_v14   ;;  %vm291_vm7 = vcmp.eq.s32.totalorder %v281_v44, 1 }
 0x12e   :  { %v560_v3 = vpop.permute.xlu1 %559  ;;  %v301_v54 = vsel %vm291_vm7, %v2445_v5, 0.0 }
 0x12f   :  { %vm568_vm3 = vcmp.eq.s32.totalorder %v560_v3, 1  ;;  %v119_v3 = vsel %vm109_vm5, %v2437_v58, 0.0  ;;  %v307_v0 = vadd.f32 %v301_v54, %v215_v16  ;;  %v2539_v54 = vsel %vm1326_vm14, 1, %v3329_v29 }
 0x130   :  { %v578_v28 = vsel %vm568_vm3, %v2487_v8, 0.0  ;;  %1729 = vset.pattern.permute.xlu1 %v3325_v18  ;;  %v287_v39 = vpop.permute.xlu0 %286  ;;  %v217_v44 = vadd.f32 %v211_v60, %v119_v3 }
 0x131   :  { %v2500_v13 = vadd.f32 %v578_v28, %v492_v30  ;;  %1007 = vperm.xlu1 %1729, %v960_v21   ;;  %1295 = vperm.xlu0 %1738, %v2490_v45   ;;  %vm293_vm9 = vcmp.eq.s32.totalorder %v287_v39, 1  ;;  %v2527_v39 = vsel %vm1235_vm11, 1, %v3329_v29 }
 0x132   :  { %v303_v26 = vsel %vm293_vm9, %v2445_v5, 0.0 }
 0x133   :  { %v2506_v1 = vpop.permute.xlu1 %599  ;;  %v309_v16 = vadd.f32 %v303_v26, %v217_v44  ;;  %v1779_v44 = vld [vmem:[%s3273_s0 + $0x18] sm:$0xff] }
 0x134   :  { %3372 = vst [vmem:[#allocation68_spill] sm:$0xff] %v2506_v1  ;;  %v364_v30 = vpop.permute.xlu0 %363  ;;  %vm1417_vm0 = vcmp.eq.s32.totalorder %v1779_v44, 15  ;;  %v2572_v1 = vsel %vm1418_vm4, 1, %v3329_v29 }
 0x135   :  { %vm380_vm10 = vcmp.eq.s32.totalorder %v364_v30, 1  ;;  %1010 = vperm.xlu1 %1729, %v2018_v40   ;;  %1384 = vperm.xlu0 %1738, %v2504_v2   ;;  %3378 = vst [vmem:[#allocation74_spill] sm:$0xff] %v2572_v1 }
 0x136   :  { %v390_v21 = vsel %vm380_vm10, %v2459_v31, 0.0 }
 0x137   :  { %v396_v9 = vadd.f32 %v390_v21, %v304_v11  ;;  %v2518_v41 = vpop.permute.xlu1 %605 }
 0x138   :  { %3373 = vst [vmem:[#allocation69_spill] sm:$0xff] %v2518_v41  ;;  %v373_v28 = vpop.permute.xlu0 %372 }
 0x139   :  { %vm383_vm13 = vcmp.eq.s32.totalorder %v373_v28, 1  ;;  %1013 = vperm.xlu1 %1729, %v2028_v42   ;;  %1473 = vperm.xlu0 %1738, %v2516_v27   ;;  %v2550_v28 = vsel %vm1417_vm0, 1, %v3329_v29 }
 0x13a   :  { %v393_v40 = vsel %vm383_vm13, %v2459_v31, 0.0 }
 0x13b   :  { %v399_v11 = vadd.f32 %v393_v40, %v307_v0  ;;  %v2529_v3 = vpop.permute.xlu1 %608 }
 0x13c   :  { %3374 = vst [vmem:[#allocation70_spill] sm:$0xff] %v2529_v3  ;;  %v379_v60 = vpop.permute.xlu0 %378 }
 0x13d   :  { %vm385_vm15 = vcmp.eq.s32.totalorder %v379_v60, 1  ;;  %1730 = vset.pattern.permute.xlu1 %v3329_v29  ;;  %1298 = vperm.xlu0 %1738, %v2527_v39  }
 0x13e   :  { %v395_v42 = vsel %vm385_vm15, %v2459_v31, 0.0  ;;  %1062 = vperm.xlu1 %1730, %v1053_v7  }
 0x13f   :  { %v401_v30 = vadd.f32 %v395_v42, %v309_v16  ;;  %v2541_v21 = vpop.permute.xlu1 %614  ;;  %v1780_v16 = vld [vmem:[%s3273_s0 + $0x28] sm:$0xff] }
 0x140   :  { %3375 = vst [vmem:[#allocation71_spill] sm:$0xff] %v2541_v21  ;;  %v456_v0 = vpop.permute.xlu0 %455  ;;  %vm1327_vm2 = vcmp.eq.s32.totalorder %v1780_v16, 14  ;;  %vm1419_vm7 = vcmp.eq.s32.totalorder %v1780_v16, 15 }
 0x141   :  { %vm472_vm1 = vcmp.eq.s32.totalorder %v456_v0, 1  ;;  %1387 = vperm.xlu0 %1738, %v2539_v54   ;;  %v2560_v0 = vsel %vm1327_vm2, 1, %v3329_v29 }
 0x142   :  { %v482_v26 = vsel %vm472_vm1, %v2468_v34, 0.0  ;;  %1731 = vset.pattern.permute.xlu1 %v3325_v18  ;;  %3376 = vst [vmem:[#allocation72_spill] sm:$0xff] %v2560_v0 }
 0x143   :  { %v488_v40 = vadd.f32 %v482_v26, %v396_v9  ;;  %1102 = vperm.xlu1 %1731, %v1053_v7   ;;  %v2568_v26 = vsub.s32 6, %v2130_v12 }
 0x144   :  { %v2555_v60 = vpop.permute.xlu1 %642  ;;  %v465_v42 = vpop.permute.xlu0 %464 }
 0x145   :  { %vm475_vm3 = vcmp.eq.s32.totalorder %v465_v42, 1  ;;  %1476 = vperm.xlu0 %1738, %v2550_v28   ;;  %3377 = vst [vmem:[#allocation73_spill] sm:$0xff] %v2568_v26  ;;  %v2582_v4 = vrot.slane %v2422_v51, %v2568_v26 }
 0x146   :  { %v485_v44 = vsel %vm475_vm3, %v2468_v34, 0.0 }
 0x147   :  { %v491_v41 = vadd.f32 %v485_v44, %v399_v11  ;;  %1732 = vset.pattern.permute.xlu1 %v3329_v29  ;;  %v2577_v11 = vld [vmem:[%s3273_s0] sm:$0xff] }
 0x148   :  { %976 = vperm.xlu1 %1732, %v2366_v36   ;;  %v2564_v9 = vpop.permute.xlu1 %645  ;;  %v471_v7 = vpop.permute.xlu0 %470  ;;  %vm1138_vm6 = vcmp.eq.s32.totalorder %v2577_v11, 12  ;;  %vm1322_vm4 = vcmp.eq.s32.totalorder %v2577_v11, 14 }
 0x149   :  { %vm477_vm5 = vcmp.eq.s32.totalorder %v471_v7, 1  ;;  %1390 = vperm.xlu0 %1738, %v2560_v0   ;;  %v1144_v3 = vsel %vm1138_vm6, 1, %v3329_v29 }
 0x14a   :  { %v487_v42 = vsel %vm477_vm5, %v2468_v34, 0.0 }
 0x14b   :  { %v493_v36 = vadd.f32 %v487_v42, %v401_v30  ;;  %v2590_v30 = vsel %vm1419_vm7, 1, %v3329_v29 }
 0x14c   :  { %1065 = vperm.xlu1 %1732, %v2377_v37   ;;  %v652_v44 = vpop.permute.xlu1 %651  ;;  %v548_v7 = vpop.permute.xlu0 %547 }
 0x14d   :  { %vm660_vm8 = vcmp.eq.s32.totalorder %v652_v44, 1  ;;  %vm564_vm9 = vcmp.eq.s32.totalorder %v548_v7, 1  ;;  %1479 = vperm.xlu0 %1738, %v2572_v1  }
 0x14e   :  { %v670_v21 = vsel %vm660_vm8, %v2582_v4, 0.0  ;;  %v574_v33 = vsel %vm564_vm9, %v2487_v8, 0.0 }
 0x14f   :  { %v676_v16 = vadd.f32 %v670_v21, %v2500_v13  ;;  %v2593_v42 = vadd.f32 %v574_v33, %v488_v40 }
 0x150   :  { %1151 = vperm.xlu1 %1732, %v1144_v3   ;;  %v557_v37 = vpop.permute.xlu0 %556 }
 0x151   :  { %vm567_vm10 = vcmp.eq.s32.totalorder %v557_v37, 1  ;;  %v2595_v44 = vpop.permute.xlu1 %691  ;;  %1482 = vperm.xlu0 %1738, %v2590_v30  }
 0x152   :  { %3379 = vst [vmem:[#allocation75_spill] sm:$0xff] %v2595_v44  ;;  %v577_v7 = vsel %vm567_vm10, %v2487_v8, 0.0 }
 0x153   :  { %v583_v26 = vadd.f32 %v577_v7, %v491_v41 }
 0x154   :  { %1733 = vset.pattern.permute.xlu1 %v3325_v18  ;;  %v563_v1 = vpop.permute.xlu0 %562 }
 0x155   :  { %vm569_vm11 = vcmp.eq.s32.totalorder %v563_v1, 1  ;;  %1191 = vperm.xlu1 %1733, %v1144_v3   ;;  %v2600_v0 = vpop.permute.xlu1 %697 }
 0x156   :  { %3380 = vst [vmem:[#allocation76_spill] sm:$0xff] %v2600_v0  ;;  %v579_v33 = vsel %vm569_vm11, %v2487_v8, 0.0  ;;  %vm197_vm11 = vcmp.eq.s32.totalorder %v2219_v24, 1 }
 0x157   :  { %v585_v13 = vadd.f32 %v579_v33, %v493_v36 }
 0x158   :  { %v2603_v21 = vpop.permute.xlu0 %639 }
 0x159   :  { %1194 = vperm.xlu1 %1733, %v2045_v46   ;;  %v2606_v40 = vpop.permute.xlu1 %700 }
 0x15a   :  { %3381 = vst [vmem:[#allocation77_spill] sm:$0xff] %v2606_v40 }
 0x15c   :  { %v649_v37 = vpop.permute.xlu0 %648 }
 0x15d   :  { %vm659_vm12 = vcmp.eq.s32.totalorder %v649_v37, 1  ;;  %1019 = vperm.xlu1 %1733, %v2054_v48   ;;  %v2609_v41 = vpop.permute.xlu1 %706  ;;  %v2621_v48 = vld [vmem:[%s3273_s0 + $0x8] sm:$0xff] }
 0x15e   :  { %3382 = vst [vmem:[#allocation78_spill] sm:$0xff] %v2609_v41  ;;  %v669_v1 = vsel %vm659_vm12, %v2582_v4, 0.0  ;;  %vm1231_vm14 = vcmp.eq.s32.totalorder %v2621_v48, 13  ;;  %vm1415_vm10 = vcmp.eq.s32.totalorder %v2621_v48, 15  ;;  %vm656_vm12 = vcmp.eq.s32.totalorder %v2603_v21, 1  ;;  %v3389_v48 = vld [vmem:[#allocation14_spill] sm:$0xff] }
 0x15f   :  { %v675_v3 = vadd.f32 %v669_v1, %v583_v26  ;;  %v2626_v26 = vsub.s32 7, %v2130_v12  ;;  %v1237_v37 = vsel %vm1231_vm14, 1, %v3329_v29  ;;  %vm198_vm14 = vcmp.eq.s32.totalorder %v2227_v43, 1 }
 0x160   :  { %v655_v7 = vpop.permute.xlu0 %654 }
 0x161   :  { %vm661_vm13 = vcmp.eq.s32.totalorder %v655_v7, 1  ;;  %1108 = vperm.xlu1 %1733, %v2060_v49   ;;  %3383 = vst [vmem:[#allocation79_spill] sm:$0xff] %v2626_v26 }
 0x162   :  { %v671_v36 = vsel %vm661_vm13, %v2582_v4, 0.0  ;;  %v2614_v33 = vpop.permute.xlu1 %734  ;;  %vm105_vm13 = vcmp.eq.s32.totalorder %v2148_v23, 1  ;;  %v208_v23 = vsel %vm198_vm14, %v2427_v38, 0.0  ;;  %vm658_vm14 = vcmp.eq.s32.totalorder %v2564_v9, 1 }
 0x163   :  { %v677_v46 = vadd.f32 %v671_v36, %v585_v13  ;;  %v2633_v13 = vrot.slane %v2422_v51, %v2626_v26  ;;  %v115_v21 = vsel %vm105_vm13, %v2437_v58, 0.0 }
 0x164   :  { %v2616_v0 = vpop.permute.xlu0 %731 }
 0x165   :  { %1197 = vperm.xlu1 %1733, %v2067_v50  }
 0x166   :  { %v2628_v49 = vpop.permute.xlu1 %737 }
 0x168   :  { %v741_v1 = vpop.permute.xlu0 %740 }
 0x169   :  { %vm751_vm15 = vcmp.eq.s32.totalorder %v741_v1, 1  ;;  %1734 = vset.pattern.permute.xlu1 %v3329_v29 }
 0x16a   :  { %v761_v7 = vsel %vm751_vm15, %v2633_v13, 0.0  ;;  %1246 = vperm.xlu1 %1734, %v1237_v37   ;;  %v744_v36 = vpop.permute.xlu1 %743  ;;  %vm289_vm15 = vcmp.eq.s32.totalorder %v2269_v35, 1 }
 0x16b   :  { %v767_v50 = vadd.f32 %v761_v7, %v675_v3  ;;  %vm752_vm0 = vcmp.eq.s32.totalorder %v744_v36, 1  ;;  %v2647_v3 = vld [vmem:[%s3276_s3 + $0x8] sm:$0xff]  ;;  %v299_v43 = vsel %vm289_vm15, %v2445_v5, 0.0 }
 0x16c   :  { %v762_v12 = vsel %vm752_vm0, %v2633_v13, 0.0  ;;  %v747_v44 = vpop.permute.xlu0 %746  ;;  %vm106_vm0 = vcmp.eq.s32.totalorder %v3389_v48, 1 }
 0x16d   :  { %v768_v40 = vadd.f32 %v762_v12, %v676_v16  ;;  %vm753_vm1 = vcmp.eq.s32.totalorder %v747_v44, 1  ;;  %v2654_v12 = vrot.slane %v2647_v3, %v2138_v17 }
 0x16e   :  { %v763_v41 = vsel %vm753_vm1, %v2633_v13, 0.0  ;;  %1735 = vset.pattern.permute.xlu1 %v3325_v18  ;;  %vm381_vm1 = vcmp.eq.s32.totalorder %v2312_v62, 1  ;;  %v116_v62 = vsel %vm106_vm0, %v2437_v58, 0.0  ;;  %vm750_vm0 = vcmp.eq.s32.totalorder %v2628_v49, 1 }
 0x16f   :  { %v769_v51 = vadd.f32 %v763_v41, %v677_v46  ;;  %1286 = vperm.xlu1 %1735, %v1237_v37   ;;  %v2640_v1 = vpop.permute.xlu1 %783 }
 0x170   :  { %3384 = vst [vmem:[#allocation80_spill] sm:$0xff] %v2640_v1  ;;  %v2642_v26 = vpop.permute.xlu0 %823 }
 0x173   :  { %1736 = vset.pattern.permute.xlu1 %v3329_v29  ;;  %v2650_v7 = vpop.permute.xlu1 %789 }
 0x174   :  { %3385 = vst [vmem:[#allocation81_spill] sm:$0xff] %v2650_v7  ;;  %982 = vperm.xlu1 %1736, %v2392_v32   ;;  %v833_v16 = vpop.permute.xlu0 %832  ;;  %v2669_v32 = vrot.slane %v2647_v3, %v2144_v20 }
 0x175   :  { %vm843_vm2 = vcmp.eq.s32.totalorder %v833_v16, 1 }
 0x176   :  { %v853_v44 = vsel %vm843_vm2, %v2654_v12, 0.0  ;;  %vm748_vm2 = vcmp.eq.s32.totalorder %v2616_v0, 1 }
 0x177   :  { %v859_v41 = vadd.f32 %v853_v44, %v767_v50  ;;  %v2658_v46 = vpop.permute.xlu1 %792 }
 0x178   :  { %3386 = vst [vmem:[#allocation82_spill] sm:$0xff] %v2658_v46  ;;  %1071 = vperm.xlu1 %1736, %v2401_v52   ;;  %v839_v37 = vpop.permute.xlu0 %838 }
 0x179   :  { %vm845_vm3 = vcmp.eq.s32.totalorder %v839_v37, 1 }
 0x17a   :  { %v855_v36 = vsel %vm845_vm3, %v2654_v12, 0.0  ;;  %vm290_vm3 = vcmp.eq.s32.totalorder %v2277_v47, 1 }
 0x17b   :  { %v861_v7 = vadd.f32 %v855_v36, %v769_v51  ;;  %v2662_v1 = vpop.permute.xlu1 %798  ;;  %v1328_v51 = vsel %vm1322_vm4, 1, %v3329_v29  ;;  %vm473_vm4 = vcmp.eq.s32.totalorder %v2361_v19, 1  ;;  %v300_v47 = vsel %vm290_vm3, %v2445_v5, 0.0 }
 0x17c   :  { %3387 = vst [vmem:[#allocation83_spill] sm:$0xff] %v2662_v1  ;;  %1160 = vperm.xlu1 %1736, %v2409_v6   ;;  %v2665_v17 = vpop.permute.xlu0 %915  ;;  %v483_v19 = vsel %vm473_vm4, %v2468_v34, 0.0 }
 0x17d   :  { %vm932_vm13 = vcmp.eq.s32.totalorder %v2665_v17, 1 }
 0x180   :  { %1249 = vperm.xlu1 %1736, %v2417_v15   ;;  %v2673_v52 = vpop.permute.xlu1 %826  ;;  %v925_v50 = vpop.permute.xlu0 %924 }
 0x181   :  { %vm935_vm5 = vcmp.eq.s32.totalorder %v925_v50, 1  ;;  %vm841_vm15 = vcmp.eq.s32.totalorder %v2673_v52, 1 }
 0x182   :  { %v945_v16 = vsel %vm935_vm5, %v2669_v32, 0.0  ;;  %vm382_vm5 = vcmp.eq.s32.totalorder %v2319_v22, 1 }
 0x183   :  { %v951_v44 = vadd.f32 %v945_v16, %v859_v41  ;;  %v2686_v41 = vrot.slane %v2647_v3, %v2172_v25  ;;  %v392_v58 = vsel %vm382_vm5, %v2459_v31, 0.0 }
 0x184   :  { %1335 = vperm.xlu1 %1736, %v1328_v51   ;;  %v2677_v6 = vpop.permute.xlu1 %829  ;;  %v931_v37 = vpop.permute.xlu0 %930 }
 0x185   :  { %vm937_vm6 = vcmp.eq.s32.totalorder %v931_v37, 1 }
 0x186   :  { %v947_v36 = vsel %vm937_vm6, %v2669_v32, 0.0  ;;  %vm565_vm6 = vcmp.eq.s32.totalorder %v2447_v10, 1 }
 0x187   :  { %v953_v46 = vadd.f32 %v947_v36, %v861_v7 }
 0x188   :  { %1737 = vset.pattern.permute.xlu1 %v3325_v18  ;;  %v836_v15 = vpop.permute.xlu1 %835  ;;  %v2681_v11 = vpop.permute.xlu0 %1099 }
 0x189   :  { %3388 = vst [vmem:[#allocation84_spill] sm:$0xff] %v2681_v11  ;;  %vm844_vm7 = vcmp.eq.s32.totalorder %v836_v15, 1  ;;  %1375 = vperm.xlu1 %1737, %v1328_v51  }
 0x18a   :  { %v854_v50 = vsel %vm844_vm7, %v2654_v12, 0.0  ;;  %vm840_vm7 = vcmp.eq.s32.totalorder %v2642_v26, 1 }
 0x18b   :  { %v2688_v16 = vadd.f32 %v854_v50, %v768_v40  ;;  %v850_v26 = vsel %vm840_vm7, %v2654_v12, 0.0 }
 0x18c   :  { %v1017_v1 = vpop.permute.xlu0 %1016 }
 0x18d   :  { %vm1027_vm8 = vcmp.eq.s32.totalorder %v1017_v1, 1  ;;  %1378 = vperm.xlu1 %1737, %v2082_v53   ;;  %v2691_v7 = vpop.permute.xlu1 %875 }
 0x18e   :  { %v1037_v37 = vsel %vm1027_vm8, %v2686_v41, 0.0 }
 0x18f   :  { %v2694_v36 = vadd.f32 %v1037_v37, %v951_v44 }
 0x190   :  { %v2696_v15 = vpop.permute.xlu0 %1105 }
 0x191   :  { %1114 = vperm.xlu1 %1737, %v2091_v55   ;;  %v2699_v51 = vpop.permute.xlu1 %881 }
 0x194   :  { %v2701_v11 = vpop.permute.xlu0 %1283 }
 0x195   :  { %1203 = vperm.xlu1 %1737, %v2100_v57   ;;  %v2704_v40 = vpop.permute.xlu1 %884  ;;  %v1421_v57 = vsel %vm1415_vm10, 1, %v3329_v29  ;;  %vm657_vm10 = vcmp.eq.s32.totalorder %v2555_v60, 1 }
 0x198   :  { %v1023_v1 = vpop.permute.xlu0 %1022 }
 0x199   :  { %vm1029_vm9 = vcmp.eq.s32.totalorder %v1023_v1, 1  ;;  %1292 = vperm.xlu1 %1737, %v2110_v59   ;;  %v2707_v53 = vpop.permute.xlu1 %890  ;;  %v207_v59 = vsel %vm197_vm11, %v2427_v38, 0.0  ;;  %v214_v1 = vadd.f32 %v208_v23, %v116_v62  ;;  %v758_v38 = vsel %vm748_vm2, %v2633_v13, 0.0 }
 0x19a   :  { %v1039_v44 = vsel %vm1029_vm9, %v2686_v41, 0.0  ;;  %v213_v35 = vadd.f32 %v207_v59, %v115_v21  ;;  %vm474_vm9 = vcmp.eq.s32.totalorder %v2371_v56, 1  ;;  %vm566_vm11 = vcmp.eq.s32.totalorder %v2470_v61, 1 }
 0x19b   :  { %v2710_v50 = vadd.f32 %v1039_v44, %v953_v46  ;;  %v391_v46 = vsel %vm381_vm1, %v2459_v31, 0.0  ;;  %v306_v59 = vadd.f32 %v300_v47, %v214_v1  ;;  %v484_v31 = vsel %vm474_vm9, %v2468_v34, 0.0 }
 0x19c   :  { %v305_v44 = vadd.f32 %v299_v43, %v213_v35  ;;  %v576_v61 = vsel %vm566_vm11, %v2487_v8, 0.0  ;;  %vm842_vm2 = vcmp.eq.s32.totalorder %v2677_v6, 1  ;;  %v760_v43 = vsel %vm750_vm0, %v2633_v13, 0.0 }
 0x19d   :  { %1381 = vperm.xlu1 %1737, %v2120_v63   ;;  %v666_v63 = vsel %vm656_vm12, %v2582_v4, 0.0  ;;  %vm749_vm12 = vcmp.eq.s32.totalorder %v2614_v33, 1  ;;  %v398_v60 = vadd.f32 %v392_v58, %v306_v59  ;;  %v1783_v59 = vld [vmem:[%s3275_s2] sm:$0xff] }
 0x19e   :  { %v2715_v55 = vpop.permute.xlu1 %918  ;;  %v672_v37 = vadd.f32 %v666_v63, %v2593_v42  ;;  %v397_v22 = vadd.f32 %v391_v46, %v305_v44  ;;  %v575_v42 = vsel %vm565_vm6, %v2487_v8, 0.0  ;;  %v759_v17 = vsel %vm749_vm12, %v2633_v13, 0.0 }
 0x19f   :  { %v490_v34 = vadd.f32 %v484_v31, %v398_v60  ;;  %vm933_vm1 = vcmp.eq.s32.totalorder %v2715_v55, 1  ;;  %v851_v8 = vsel %vm841_vm15, %v2654_v12, 0.0  ;;  %v3394_v31 = vld [vmem:[#allocation66_spill] sm:$0xff] }
 0x1a0   :  { %v489_v48 = vadd.f32 %v483_v19, %v397_v22  ;;  %v943_v35 = vsel %vm933_vm1, %v2669_v32, 0.0  ;;  %v2815_v60 = vrot.slane %v1783_v59, %v3394_v31 }
 0x1a1   :  { %1739 = vset.pattern.permute.xlu1 %v3329_v29  ;;  %v582_v21 = vadd.f32 %v576_v61, %v490_v34  ;;  %v3397_v34 = vld [vmem:[#allocation67_spill] sm:$0xff] }
 0x1a2   :  { %1430 = vperm.xlu1 %1739, %v1421_v57   ;;  %v2727_v24 = vpop.permute.xlu1 %921 }
 0x1a3   :  { %vm934_vm4 = vcmp.eq.s32.totalorder %v2727_v24, 1 }
 0x1a4   :  { %v944_v13 = vsel %vm934_vm4, %v2669_v32, 0.0 }
 0x1a6   :  { %1740 = vset.pattern.permute.xlu1 %v3325_v18  ;;  %v928_v0 = vpop.permute.xlu1 %927  ;;  %v764_v18 = vadd.f32 %v758_v38, %v672_v37 }
 0x1a7   :  { %vm936_vm8 = vcmp.eq.s32.totalorder %v928_v0, 1  ;;  %1470 = vperm.xlu1 %1740, %v1421_v57   ;;  %v581_v57 = vadd.f32 %v575_v42, %v489_v48  ;;  %v3391_v42 = vld [vmem:[#allocation72_spill] sm:$0xff] }
 0x1a8   :  { %v946_v10 = vsel %vm936_vm8, %v2669_v32, 0.0  ;;  %v856_v63 = vadd.f32 %v850_v26, %v764_v18  ;;  %v3392_v18 = vld [vmem:[#allocation74_spill] sm:$0xff] }
 0x1a9   :  { %v2751_v5 = vadd.f32 %v946_v10, %v2688_v16  ;;  %v667_v16 = vsel %vm657_vm10, %v2582_v4, 0.0 }
 0x1aa   :  { %v673_v33 = vadd.f32 %v667_v16, %v581_v57  ;;  %v3395_v57 = vld [vmem:[#allocation24_spill] sm:$0xff]  ;;  %v3396_v16 = vld [vmem:[#allocation18_spill] sm:$0xff] }
 0x1ab   :  { %1741 = vset.pattern.permute.xlu1 %v3329_v29  ;;  %v2759_v56 = vpop.permute.xlu1 %967  ;;  %v942_v29 = vsel %vm932_vm13, %v2669_v32, 0.0  ;;  %v3390_v32 = vld [vmem:[#allocation65_spill] sm:$0xff]  ;;  %vm436_vm9 = vcmp.eq.s32.totalorder %v3395_v57, 1 }
 0x1ac   :  { %1166 = vperm.xlu1 %1741, %v2473_v14   ;;  %v668_v14 = vsel %vm658_vm14, %v2582_v4, 0.0  ;;  %v765_v23 = vadd.f32 %v759_v17, %v673_v33  ;;  %v948_v52 = vadd.f32 %v942_v29, %v856_v63  ;;  %v2794_v19 = vrot.slane %v2647_v3, %v3390_v32  ;;  %v3398_v33 = vld [vmem:[#allocation26_spill] sm:$0xff] }
 0x1ad   :  { %v674_v55 = vadd.f32 %v668_v14, %v582_v21  ;;  %v2809_v48 = vrot.slane %v1783_v59, %v3390_v32  ;;  %v446_v63 = vsel %vm436_vm9, %v2815_v60, 0.0  ;;  %v2822_v17 = vrot.slane %v1783_v59, %v3397_v34  ;;  %v2830_v21 = vld [vmem:[%s3275_s2 + $0x8] sm:$0xff] }
 0x1ae   :  { %v857_v62 = vadd.f32 %v851_v8, %v765_v23  ;;  %vm528_vm10 = vcmp.eq.s32.totalorder %v3398_v33, 1  ;;  %v3413_v33 = vld [vmem:[#allocation28_spill] sm:$0xff]  ;;  %vm1118_vm9 = vcmp.eq.s32.totalorder %v2696_v15, 1  ;;  %v3418_v15 = vld [vmem:[#allocation38_spill] sm:$0xff] }
 0x1af   :  { %v766_v37 = vadd.f32 %v760_v43, %v674_v55  ;;  %v3401_v43 = vld [vmem:[#allocation10_spill] sm:$0xff]  ;;  %v2849_v55 = vrot.slane %v2647_v3, %v3394_v31 }
 0x1b0   :  { %1255 = vperm.xlu1 %1741, %v2490_v45   ;;  %v1008_v9 = vpop.permute.xlu1 %1007  ;;  %v852_v45 = vsel %vm842_vm2, %v2654_v12, 0.0  ;;  %v949_v6 = vadd.f32 %v943_v35, %v857_v62  ;;  %v2841_v35 = vrot.slane %v2830_v21, %v3401_v43 }
 0x1b1   :  { %vm1024_vm3 = vcmp.eq.s32.totalorder %v1008_v9, 1  ;;  %v858_v44 = vadd.f32 %v852_v45, %v766_v37  ;;  %v3400_v9 = vld [vmem:[#allocation79_spill] sm:$0xff]  ;;  %v3402_v45 = vld [vmem:[#allocation6_spill] sm:$0xff]  ;;  %v3404_v37 = vld [vmem:[#allocation29_spill] sm:$0xff] }
 0x1b2   :  { %v1034_v49 = vsel %vm1024_vm3, %v2686_v41, 0.0  ;;  %v2836_v23 = vrot.slane %v1783_v59, %v3400_v9  ;;  %vm64_vm11 = vcmp.eq.s32.totalorder %v3402_v45, 1  ;;  %vm620_vm13 = vcmp.eq.s32.totalorder %v3404_v37, 1 }
 0x1b3   :  { %v2778_v4 = vadd.f32 %v1034_v49, %v948_v52  ;;  %v950_v24 = vadd.f32 %v944_v13, %v858_v44  ;;  %v538_v52 = vsel %vm528_vm10, %v2822_v17, 0.0  ;;  %v2845_v49 = vrot.slane %v2830_v21, %v2144_v20 }
 0x1b4   :  { %1344 = vperm.xlu1 %1741, %v2504_v2   ;;  %v1011_v46 = vpop.permute.xlu1 %1010  ;;  %v2857_v13 = vrot.slane %v2830_v21, %v2172_v25  ;;  %v2861_v20 = vrot.slane %v2830_v21, %v3390_v32  ;;  %v3410_v25 = vld [vmem:[#allocation13_spill] sm:$0xff] }
 0x1b5   :  { %vm1025_vm5 = vcmp.eq.s32.totalorder %v1011_v46, 1  ;;  %v3403_v46 = vld [vmem:[#allocation22_spill] sm:$0xff] }
 0x1b6   :  { %v1035_v1 = vsel %vm1025_vm5, %v2686_v41, 0.0  ;;  %vm159_vm12 = vcmp.eq.s32.totalorder %v3403_v46, 1 }
 0x1b7   :  { %v1041_v38 = vadd.f32 %v1035_v1, %v949_v6  ;;  %v3405_v6 = vld [vmem:[#allocation7_spill] sm:$0xff]  ;;  %v1112_v1 = vpop.permute.xlu0 %1111 }
 0x1b8   :  { %1433 = vperm.xlu1 %1741, %v2516_v27   ;;  %v1014_v0 = vpop.permute.xlu1 %1013  ;;  %vm67_vm15 = vcmp.eq.s32.totalorder %v3405_v6, 1  ;;  %vm1120_vm5 = vcmp.eq.s32.totalorder %v1112_v1, 1  ;;  %v3415_v1 = vld [vmem:[#allocation36_spill] sm:$0xff] }
 0x1b9   :  { %vm1026_vm6 = vcmp.eq.s32.totalorder %v1014_v0, 1  ;;  %v3407_v0 = vld [vmem:[#allocation11_spill] sm:$0xff]  ;;  %v1130_v37 = vsel %vm1120_vm5, %v2794_v19, 0.0 }
 0x1ba   :  { %v1036_v47 = vsel %vm1026_vm6, %v2686_v41, 0.0  ;;  %vm157_vm1 = vcmp.eq.s32.totalorder %v3407_v0, 1  ;;  %v3416_v0 = vld [vmem:[#allocation46_spill] sm:$0xff] }
 0x1bb   :  { %v2786_v12 = vadd.f32 %v1036_v47, %v950_v24 }
 0x1bc   :  { %1258 = vperm.xlu1 %1741, %v2527_v39  }
 0x1bd   :  { %v2789_v2 = vpop.permute.xlu1 %1062 }
 0x1c0   :  { %1347 = vperm.xlu1 %1741, %v2539_v54   ;;  %v3393_v54 = vld [vmem:[#allocation21_spill] sm:$0xff] }
 0x1c1   :  { %vm344_vm8 = vcmp.eq.s32.totalorder %v3393_v54, 1 }
 0x1c2   :  { %v1103_v22 = vpop.permute.xlu1 %1102 }
 0x1c3   :  { %vm1117_vm7 = vcmp.eq.s32.totalorder %v1103_v22, 1  ;;  %v3408_v22 = vld [vmem:[#allocation12_spill] sm:$0xff] }
 0x1c4   :  { %v1127_v27 = vsel %vm1117_vm7, %v2794_v19, 0.0  ;;  %1436 = vperm.xlu1 %1741, %v2550_v28   ;;  %v354_v28 = vsel %vm344_vm8, %v2809_v48, 0.0  ;;  %vm248_vm7 = vcmp.eq.s32.totalorder %v3413_v33, 1  ;;  %vm804_vm8 = vcmp.eq.s32.totalorder %v3415_v1, 1  ;;  %v3423_v1 = vld [vmem:[#allocation35_spill] sm:$0xff] }
 0x1c5   :  { %v1133_v58 = vadd.f32 %v1127_v27, %v1041_v38  ;;  %v360_v61 = vadd.f32 %v354_v28, %v3396_v16  ;;  %v3406_v38 = vld [vmem:[#allocation8_spill] sm:$0xff]  ;;  %v74_v27 = vsel %vm64_vm11, %v3408_v22, 0.0  ;;  %v3412_v28 = vld [vmem:[#allocation33_spill] sm:$0xff]  ;;  %v2881_v16 = vsel %vm157_vm1, %v3410_v25, 0.0 }
 0x1c6   :  { %vm65_vm0 = vcmp.eq.s32.totalorder %v3406_v38, 1  ;;  %vm712_vm4 = vcmp.eq.s32.totalorder %v3412_v28, 1  ;;  %vm345_vm11 = vcmp.eq.s32.totalorder %v3416_v0, 1  ;;  %v3424_v0 = vld [vmem:[#allocation63_spill] sm:$0xff] }
 0x1c7   :  { %v2798_v10 = vpop.permute.xlu1 %976  ;;  %v452_v14 = vadd.f32 %v446_v63, %v360_v61  ;;  %v2878_v57 = vsel %vm65_vm0, %v3408_v22, 0.0  ;;  %v722_v46 = vsel %vm712_vm4, %v2836_v23, 0.0 }
 0x1c8   :  { %1350 = vperm.xlu1 %1741, %v3391_v42   ;;  %v3409_v42 = vld [vmem:[#allocation17_spill] sm:$0xff] }
 0x1c9   :  { %v544_v24 = vadd.f32 %v538_v52, %v452_v14  ;;  %vm156_vm2 = vcmp.eq.s32.totalorder %v3409_v42, 1 }
 0x1ca   :  { %v166_v63 = vsel %vm156_vm2, %v3410_v25, 0.0 }
 0x1cb   :  { %v2801_v39 = vpop.permute.xlu1 %1065 }
 0x1cc   :  { %1439 = vperm.xlu1 %1741, %v3392_v18   ;;  %v169_v18 = vsel %vm159_vm12, %v3410_v25, 0.0 }
 0x1cf   :  { %v2811_v26 = vpop.permute.xlu1 %1151 }
 0x1d0   :  { %1442 = vperm.xlu1 %1741, %v2590_v30   ;;  %v3399_v30 = vld [vmem:[#allocation73_spill] sm:$0xff] }
 0x1d1   :  { %v2833_v8 = vrot.slane %v1783_v59, %v3399_v30  ;;  %v3411_v59 = vld [vmem:[#allocation32_spill] sm:$0xff] }
 0x1d2   :  { %vm251_vm3 = vcmp.eq.s32.totalorder %v3411_v59, 1  ;;  %v3419_v59 = vld [vmem:[#allocation57_spill] sm:$0xff] }
 0x1d3   :  { %v630_v54 = vsel %vm620_vm13, %v2833_v8, 0.0  ;;  %vm896_vm13 = vcmp.eq.s32.totalorder %v3418_v15, 1 }
 0x1d4   :  { %v2824_v29 = vpop.permute.xlu1 %1191  ;;  %v636_v14 = vadd.f32 %v630_v54, %v544_v24 }
 0x1d6   :  { %v728_v42 = vadd.f32 %v722_v46, %v636_v14  ;;  %v3422_v14 = vld [vmem:[#allocation64_spill] sm:$0xff] }
 0x1d7   :  { %vm529_vm2 = vcmp.eq.s32.totalorder %v3422_v14, 1 }
 0x1d8   :  { %v1195_v62 = vpop.permute.xlu1 %1194 }
 0x1d9   :  { %vm1209_vm14 = vcmp.eq.s32.totalorder %v1195_v62, 1  ;;  %v3414_v62 = vld [vmem:[#allocation16_spill] sm:$0xff] }
 0x1da   :  { %v1219_v44 = vsel %vm1209_vm14, %v2849_v55, 0.0  ;;  %v261_v45 = vsel %vm251_vm3, %v3414_v62, 0.0  ;;  %v258_v38 = vsel %vm248_vm7, %v3414_v62, 0.0  ;;  %vm437_vm14 = vcmp.eq.s32.totalorder %v3419_v59, 1 }
 0x1db   :  { %v2866_v47 = vadd.f32 %v1219_v44, %v1133_v58  ;;  %v77_v58 = vsel %vm67_vm15, %v3408_v22, 0.0  ;;  %v172_v44 = vadd.f32 %v166_v63, %v74_v27  ;;  %v1128_v27 = vsel %vm1118_vm9, %v2794_v19, 0.0 }
 0x1dc   :  { %v1020_v32 = vpop.permute.xlu1 %1019  ;;  %v175_v43 = vadd.f32 %v169_v18, %v77_v58  ;;  %v3417_v18 = vld [vmem:[#allocation44_spill] sm:$0xff]  ;;  %v1134_v63 = vadd.f32 %v1128_v27, %v2786_v12  ;;  %v447_v46 = vsel %vm437_vm14, %v2815_v60, 0.0  ;;  %vm527_vm3 = vcmp.eq.s32.totalorder %v3424_v0, 1  ;;  %v3426_v27 = vld [vmem:[#allocation51_spill] sm:$0xff] }
 0x1dd   :  { %vm1028_vm6 = vcmp.eq.s32.totalorder %v1020_v32, 1  ;;  %vm343_vm12 = vcmp.eq.s32.totalorder %v3417_v18, 1  ;;  %v814_v32 = vsel %vm804_vm8, %v2841_v35, 0.0  ;;  %v3420_v58 = vld [vmem:[#allocation40_spill] sm:$0xff]  ;;  %v264_v18 = vadd.f32 %v258_v38, %v172_v44  ;;  %v3429_v38 = vld [vmem:[#allocation15_spill] sm:$0xff] }
 0x1de   :  { %v1038_v61 = vsel %vm1028_vm6, %v2686_v41, 0.0  ;;  %v267_v24 = vadd.f32 %v261_v45, %v175_v43  ;;  %vm340_vm15 = vcmp.eq.s32.totalorder %v3420_v58, 1  ;;  %v353_v33 = vsel %vm343_vm12, %v2809_v48, 0.0  ;;  %v3427_v58 = vld [vmem:[#allocation70_spill] sm:$0xff] }
 0x1df   :  { %v1044_v52 = vadd.f32 %v1038_v61, %v2751_v5  ;;  %v355_v61 = vsel %vm345_vm11, %v2809_v48, 0.0  ;;  %v820_v43 = vadd.f32 %v814_v32, %v728_v42  ;;  %v906_v45 = vsel %vm896_vm13, %v2845_v49, 0.0 }
 0x1e0   :  { %v1109_v6 = vpop.permute.xlu1 %1108  ;;  %v361_v12 = vadd.f32 %v355_v61, %v3423_v1  ;;  %v359_v15 = vadd.f32 %v353_v33, %v267_v24  ;;  %v539_v42 = vsel %vm529_vm2, %v2822_v17, 0.0  ;;  %vm432_vm5 = vcmp.eq.s32.totalorder %v3426_v27, 1  ;;  %v3431_v1 = vld [vmem:[#allocation83_spill] sm:$0xff] }
 0x1e1   :  { %vm1119_vm10 = vcmp.eq.s32.totalorder %v1109_v6, 1  ;;  %v2892_v41 = vadd.f32 %v1130_v37, %v1044_v52  ;;  %v350_v6 = vsel %vm340_vm15, %v2809_v48, 0.0  ;;  %vm619_vm6 = vcmp.eq.s32.totalorder %v3427_v58, 1 }
 0x1e2   :  { %v1129_v5 = vsel %vm1119_vm10, %v2794_v19, 0.0  ;;  %v912_v61 = vadd.f32 %v906_v45, %v820_v43  ;;  %v537_v14 = vsel %vm527_vm3, %v2822_v17, 0.0  ;;  %vm249_vm8 = vcmp.eq.s32.totalorder %v3429_v38, 1 }
 0x1e3   :  { %v2899_v54 = vadd.f32 %v1129_v5, %v2694_v36  ;;  %v3421_v36 = vld [vmem:[#allocation55_spill] sm:$0xff]  ;;  %vm805_vm10 = vcmp.eq.s32.totalorder %v3431_v1, 1  ;;  %v629_v0 = vsel %vm619_vm6, %v2833_v8, 0.0  ;;  %vm897_vm13 = vcmp.eq.s32.totalorder %v2707_v53, 1 }
 0x1e4   :  { %v1198_v28 = vpop.permute.xlu1 %1197  ;;  %vm435_vm1 = vcmp.eq.s32.totalorder %v3421_v36, 1  ;;  %v3425_v5 = vld [vmem:[#allocation71_spill] sm:$0xff]  ;;  %v356_v36 = vadd.f32 %v350_v6, %v264_v18  ;;  %v815_v27 = vsel %vm805_vm10, %v2841_v35, 0.0  ;;  %vm987_vm2 = vcmp.eq.s32.totalorder %v2798_v10, 1 }
 0x1e5   :  { %vm1210_vm0 = vcmp.eq.s32.totalorder %v1198_v28, 1  ;;  %vm621_vm4 = vcmp.eq.s32.totalorder %v3425_v5, 1  ;;  %v445_v59 = vsel %vm435_vm1, %v2815_v60, 0.0  ;;  %v453_v28 = vadd.f32 %v447_v46, %v361_v12  ;;  %v3432_v12 = vld [vmem:[#allocation61_spill] sm:$0xff]  ;;  %v3433_v5 = vld [vmem:[#allocation82_spill] sm:$0xff] }
 0x1e6   :  { %v1220_v52 = vsel %vm1210_vm0, %v2849_v55, 0.0  ;;  %v631_v44 = vsel %vm621_vm4, %v2833_v8, 0.0  ;;  %v451_v24 = vadd.f32 %v445_v59, %v359_v15  ;;  %v442_v46 = vsel %vm432_vm5, %v2815_v60, 0.0  ;;  %v3434_v15 = vld [vmem:[#allocation47_spill] sm:$0xff]  ;;  %v3435_v59 = vld [vmem:[#allocation68_spill] sm:$0xff] }
 0x1e7   :  { %v2914_v37 = vadd.f32 %v1220_v52, %v1134_v63  ;;  %v3428_v63 = vld [vmem:[#allocation78_spill] sm:$0xff]  ;;  %v545_v33 = vadd.f32 %v539_v42, %v453_v28  ;;  %v3430_v52 = vld [vmem:[#allocation77_spill] sm:$0xff]  ;;  %vm524_vm11 = vcmp.eq.s32.totalorder %v3432_v12, 1  ;;  %vm803_vm12 = vcmp.eq.s32.totalorder %v3433_v5, 1 }
 0x1e8   :  { %vm713_vm7 = vcmp.eq.s32.totalorder %v3428_v63, 1  ;;  %vm711_vm9 = vcmp.eq.s32.totalorder %v3430_v52, 1  ;;  %v543_v45 = vadd.f32 %v537_v14, %v451_v24  ;;  %vm988_vm14 = vcmp.eq.s32.totalorder %v3434_v15, 1 }
 0x1e9   :  { %v2922_v32 = vpop.permute.xlu1 %1246  ;;  %v723_v43 = vsel %vm713_vm7, %v2836_v23, 0.0  ;;  %v637_v6 = vadd.f32 %v631_v44, %v545_v33  ;;  %vm616_vm15 = vcmp.eq.s32.totalorder %v3435_v59, 1  ;;  %v721_v42 = vsel %vm711_vm9, %v2836_v23, 0.0  ;;  %v3436_v44 = vld [vmem:[#allocation75_spill] sm:$0xff] }
 0x1ea   :  { %v534_v28 = vsel %vm524_vm11, %v2822_v17, 0.0  ;;  %v635_v58 = vadd.f32 %v629_v0, %v543_v45  ;;  %vm895_vm0 = vcmp.eq.s32.totalorder %v2704_v40, 1  ;;  %v448_v14 = vadd.f32 %v442_v46, %v356_v36 }
 0x1eb   :  { %v729_v63 = vadd.f32 %v723_v43, %v637_v6  ;;  %vm708_vm1 = vcmp.eq.s32.totalorder %v3436_v44, 1  ;;  %v813_v53 = vsel %vm803_vm12, %v2841_v35, 0.0  ;;  %v907_v24 = vsel %vm897_vm13, %v2845_v49, 0.0  ;;  %v3437_v43 = vld [vmem:[#allocation80_spill] sm:$0xff] }
 0x1ec   :  { %v626_v33 = vsel %vm616_vm15, %v2833_v8, 0.0  ;;  %v727_v52 = vadd.f32 %v721_v42, %v635_v58  ;;  %v998_v12 = vsel %vm988_vm14, %v2857_v13, 0.0  ;;  %v540_v0 = vadd.f32 %v534_v28, %v448_v14  ;;  %v3438_v44 = vld [vmem:[#allocation48_spill] sm:$0xff] }
 0x1ed   :  { %v821_v1 = vadd.f32 %v815_v27, %v729_v63  ;;  %vm800_vm3 = vcmp.eq.s32.totalorder %v3437_v43, 1  ;;  %v905_v40 = vsel %vm895_vm0, %v2845_v49, 0.0  ;;  %v718_v46 = vsel %vm708_vm1, %v2836_v23, 0.0 }
 0x1ee   :  { %v2938_v18 = vpop.permute.xlu1 %1286  ;;  %v819_v45 = vadd.f32 %v813_v53, %v727_v52  ;;  %v632_v5 = vadd.f32 %v626_v33, %v540_v0  ;;  %vm892_vm5 = vcmp.eq.s32.totalorder %v2691_v7, 1  ;;  %v997_v10 = vsel %vm987_vm2, %v2857_v13, 0.0  ;;  %v2973_v52 = vpop.permute.xlu0 %1200 }
 0x1ef   :  { %v913_v6 = vadd.f32 %v907_v24, %v821_v1  ;;  %v173_v15 = vadd.f32 %v2881_v16, %v2878_v57  ;;  %v810_v42 = vsel %vm800_vm3, %v2841_v35, 0.0  ;;  %v259_v58 = vsel %vm249_vm8, %v3414_v62, 0.0  ;;  %v3439_v57 = vld [vmem:[#allocation19_spill] sm:$0xff] }
 0x1f0   :  { %v911_v27 = vadd.f32 %v905_v40, %v819_v45  ;;  %v1004_v63 = vadd.f32 %v998_v12, %v912_v61  ;;  %v724_v14 = vadd.f32 %v718_v46, %v632_v5  ;;  %vm984_vm6 = vcmp.eq.s32.totalorder %v2759_v56, 1  ;;  %v3441_v45 = vld [vmem:[#allocation43_spill] sm:$0xff] }
 0x1f1   :  { %vm1079_vm7 = vcmp.eq.s32.totalorder %v3438_v44, 1  ;;  %v902_v53 = vsel %vm892_vm5, %v2845_v49, 0.0  ;;  %vm341_vm10 = vcmp.eq.s32.totalorder %v3439_v57, 1  ;;  %v994_v38 = vsel %vm984_vm6, %v2857_v13, 0.0  ;;  %v3444_v57 = vld [vmem:[#allocation50_spill] sm:$0xff] }
 0x1f2   :  { %v1003_v24 = vadd.f32 %v997_v10, %v911_v27  ;;  %v816_v16 = vadd.f32 %v810_v42, %v724_v14  ;;  %v265_v1 = vadd.f32 %v259_v58, %v173_v15  ;;  %v2980_v56 = vrot.slane %v2830_v21, %v3394_v31  ;;  %v2996_v58 = vpop.permute.xlu0 %1289 }
 0x1f3   :  { %v983_v36 = vpop.permute.xlu1 %982  ;;  %v1089_v12 = vsel %vm1079_vm7, %v2861_v20, 0.0  ;;  %v351_v40 = vsel %vm341_vm10, %v2809_v48, 0.0  ;;  %vm1076_vm12 = vcmp.eq.s32.totalorder %v3441_v45, 1  ;;  %vm1168_vm13 = vcmp.eq.s32.totalorder %v2811_v26, 1  ;;  %v3443_v26 = vld [vmem:[#allocation25_spill] sm:$0xff] }
 0x1f4   :  { %vm989_vm4 = vcmp.eq.s32.totalorder %v983_v36, 1  ;;  %v908_v0 = vadd.f32 %v902_v53, %v816_v16  ;;  %v3440_v36 = vld [vmem:[#allocation23_spill] sm:$0xff]  ;;  %v1095_v46 = vadd.f32 %v1089_v12, %v1003_v24  ;;  %v357_v31 = vadd.f32 %v351_v40, %v265_v1 }
 0x1f5   :  { %v999_v59 = vsel %vm989_vm4, %v2857_v13, 0.0  ;;  %vm433_vm8 = vcmp.eq.s32.totalorder %v3440_v36, 1  ;;  %vm1208_vm15 = vcmp.eq.s32.totalorder %v2824_v29, 1  ;;  %v1086_v27 = vsel %vm1076_vm12, %v2861_v20, 0.0  ;;  %v3445_v12 = vld [vmem:[#allocation27_spill] sm:$0xff] }
 0x1f6   :  { %v2963_v28 = vadd.f32 %v999_v59, %v913_v6  ;;  %v1000_v6 = vadd.f32 %v994_v38, %v908_v0  ;;  %v3442_v59 = vld [vmem:[#allocation84_spill] sm:$0xff]  ;;  %v443_v42 = vsel %vm433_vm8, %v2815_v60, 0.0  ;;  %vm525_vm0 = vcmp.eq.s32.totalorder %v3443_v26, 1 }
 0x1f7   :  { %v1072_v7 = vpop.permute.xlu1 %1071  ;;  %vm1116_vm14 = vcmp.eq.s32.totalorder %v3442_v59, 1  ;;  %v3006_v29 = vrot.slane %v2830_v21, %v3399_v30  ;;  %v1218_v53 = vsel %vm1208_vm15, %v2849_v55, 0.0  ;;  %v449_v24 = vadd.f32 %v443_v42, %v357_v31  ;;  %v3447_v31 = vld [vmem:[#allocation60_spill] sm:$0xff] }
 0x1f8   :  { %vm1080_vm9 = vcmp.eq.s32.totalorder %v1072_v7, 1  ;;  %v1092_v14 = vadd.f32 %v1086_v27, %v1000_v6  ;;  %v3002_v7 = vrot.slane %v2830_v21, %v3397_v34  ;;  %v1126_v44 = vsel %vm1116_vm14, %v2794_v19, 0.0 }
 0x1f9   :  { %v1090_v33 = vsel %vm1080_vm9, %v2861_v20, 0.0  ;;  %vm1260_vm1 = vcmp.eq.s32.totalorder %v3444_v57, 1  ;;  %v535_v1 = vsel %vm525_vm0, %v2822_v17, 0.0  ;;  %vm617_vm2 = vcmp.eq.s32.totalorder %v3445_v12, 1 }
 0x1fa   :  { %v2976_v61 = vadd.f32 %v1090_v33, %v1004_v63  ;;  %v1178_v63 = vsel %vm1168_vm13, %v2980_v56, 0.0  ;;  %v1132_v33 = vadd.f32 %v1126_v44, %v2778_v4  ;;  %v3016_v0 = vrot.slane %v2647_v3, %v3397_v34  ;;  %v1468_v4 = vpop.permute.xlu0 %1467 }
 0x1fb   :  { %v1161_v43 = vpop.permute.xlu1 %1160  ;;  %v1184_v16 = vadd.f32 %v1178_v63, %v1092_v14  ;;  %vm1300_vm4 = vcmp.eq.s32.totalorder %v2701_v11, 1  ;;  %v1270_v40 = vsel %vm1260_vm1, %v3002_v7, 0.0  ;;  %v3022_v36 = vrot.slane %v2830_v21, %v3400_v9 }
 0x1fc   :  { %vm1171_vm11 = vcmp.eq.s32.totalorder %v1161_v43, 1  ;;  %v1224_v43 = vadd.f32 %v1218_v53, %v1132_v33  ;;  %v541_v45 = vadd.f32 %v535_v1, %v449_v24  ;;  %v627_v6 = vsel %vm617_vm2, %v2833_v8, 0.0 }
 0x1fd   :  { %v1181_v5 = vsel %vm1171_vm11, %v2980_v56, 0.0  ;;  %v1276_v34 = vadd.f32 %v1270_v40, %v1184_v16  ;;  %vm1444_vm6 = vcmp.eq.s32.totalorder %v3447_v31, 1  ;;  %v1310_v11 = vsel %vm1300_vm4, %v3016_v0, 0.0  ;;  %v3448_v16 = vld [vmem:[#allocation34_spill] sm:$0xff]  ;;  %v3450_v40 = vld [vmem:[#allocation20_spill] sm:$0xff] }
 0x1fe   :  { %v2988_v10 = vadd.f32 %v1181_v5, %v1095_v46  ;;  %v3446_v5 = vld [vmem:[#allocation31_spill] sm:$0xff]  ;;  %v3031_v59 = vrot.slane %v2647_v3, %v3400_v9  ;;  %v3035_v21 = vrot.slane %v2647_v3, %v3399_v30  ;;  %vm1484_vm7 = vcmp.eq.s32.totalorder %v1468_v4, 1 }
 0x1ff   :  { %v2992_v15 = vpop.permute.xlu1 %1249  ;;  %vm709_vm5 = vcmp.eq.s32.totalorder %v3446_v5, 1  ;;  %v1316_v63 = vadd.f32 %v1310_v11, %v1224_v43  ;;  %v633_v14 = vadd.f32 %v627_v6, %v541_v45  ;;  %v1454_v24 = vsel %vm1444_vm6, %v3022_v36, 0.0  ;;  %v3449_v43 = vld [vmem:[#allocation37_spill] sm:$0xff]  ;;  %v3452_v45 = vld [vmem:[#allocation30_spill] sm:$0xff]  ;;  %v3052_v5 = vpop.permute.xlu0 %1206  ;;  %v3453_v11 = vld [vmem:[#allocation39_spill] sm:$0xff] }
 0x200   :  { %v719_v53 = vsel %vm709_vm5, %v2836_v23, 0.0  ;;  %v1494_v9 = vsel %vm1484_vm7, %v3031_v59, 0.0  ;;  %vm801_vm10 = vcmp.eq.s32.totalorder %v3448_v16, 1  ;;  %vm893_vm8 = vcmp.eq.s32.totalorder %v3449_v43, 1  ;;  %v3456_v16 = vld [vmem:[#allocation62_spill] sm:$0xff] }
 0x201   :  { %v725_v33 = vadd.f32 %v719_v53, %v633_v14  ;;  %v811_v1 = vsel %vm801_vm10, %v2841_v35, 0.0  ;;  %vm158_vm11 = vcmp.eq.s32.totalorder %v3450_v40, 1  ;;  %vm250_vm13 = vcmp.eq.s32.totalorder %v3452_v45, 1  ;;  %v3455_v53 = vld [vmem:[#allocation53_spill] sm:$0xff] }
 0x202   :  { %v903_v6 = vsel %vm893_vm8, %v2845_v49, 0.0  ;;  %v168_v31 = vsel %vm158_vm11, %v3410_v25, 0.0  ;;  %vm985_vm14 = vcmp.eq.s32.totalorder %v3453_v11, 1  ;;  %vm1077_vm0 = vcmp.eq.s32.totalorder %v2789_v2, 1 }
 0x203   :  { %v1336_v38 = vpop.permute.xlu1 %1335  ;;  %v817_v4 = vadd.f32 %v811_v1, %v725_v33  ;;  %vm434_vm1 = vcmp.eq.s32.totalorder %v3455_v53, 1  ;;  %vm526_vm2 = vcmp.eq.s32.totalorder %v3456_v16, 1  ;;  %v3457_v33 = vld [vmem:[#allocation69_spill] sm:$0xff]  ;;  %vm1261_vm5 = vcmp.eq.s32.totalorder %v2922_v32, 1 }
 0x204   :  { %vm1352_vm3 = vcmp.eq.s32.totalorder %v1336_v38, 1  ;;  %v3458_v1 = vld [vmem:[#allocation45_spill] sm:$0xff]  ;;  %v536_v43 = vsel %vm526_vm2, %v2822_v17, 0.0  ;;  %vm1301_vm7 = vcmp.eq.s32.totalorder %v2938_v18, 1  ;;  %v1271_v11 = vsel %vm1261_vm5, %v3002_v7, 0.0  ;;  %v3461_v18 = vld [vmem:[#allocation52_spill] sm:$0xff] }
 0x205   :  { %v1362_v46 = vsel %vm1352_vm3, %v3006_v29, 0.0  ;;  %vm618_vm3 = vcmp.eq.s32.totalorder %v3457_v33, 1  ;;  %vm1169_vm4 = vcmp.eq.s32.totalorder %v3458_v1, 1  ;;  %vm894_vm8 = vcmp.eq.s32.totalorder %v2699_v51, 1 }
 0x206   :  { %v1368_v27 = vadd.f32 %v1362_v46, %v1276_v34  ;;  %v3451_v46 = vld [vmem:[#allocation5_spill] sm:$0xff]  ;;  %vm1353_vm11 = vcmp.eq.s32.totalorder %v3461_v18, 1  ;;  %vm1302_vm2 = vcmp.eq.s32.totalorder %v2996_v58, 1 }
 0x207   :  { %vm66_vm12 = vcmp.eq.s32.totalorder %v3451_v46, 1  ;;  %v628_v46 = vsel %vm618_vm3, %v2833_v8, 0.0  ;;  %v1311_v8 = vsel %vm1301_vm7, %v3016_v0, 0.0 }
 0x208   :  { %v1376_v42 = vpop.permute.xlu1 %1375  ;;  %v1460_v3 = vadd.f32 %v1454_v24, %v1368_v27  ;;  %v76_v27 = vsel %vm66_vm12, %v3408_v22, 0.0  ;;  %v1087_v22 = vsel %vm1077_vm0, %v2861_v20, 0.0  ;;  %v1317_v53 = vadd.f32 %v1311_v8, %v2866_v47 }
 0x209   :  { %vm1392_vm9 = vcmp.eq.s32.totalorder %v1376_v42, 1  ;;  %v3454_v42 = vld [vmem:[#allocation42_spill] sm:$0xff]  ;;  %v174_v14 = vadd.f32 %v168_v31, %v76_v27 }
 0x20a   :  { %v1402_v26 = vsel %vm1392_vm9, %v3035_v21, 0.0  ;;  %vm342_vm15 = vcmp.eq.s32.totalorder %v3454_v42, 1 }
 0x20b   :  { %v1408_v44 = vadd.f32 %v1402_v26, %v1316_v63  ;;  %v260_v63 = vsel %vm250_vm13, %v3414_v62, 0.0  ;;  %v909_v26 = vadd.f32 %v903_v6, %v817_v4  ;;  %v352_v25 = vsel %vm342_vm15, %v2809_v48, 0.0  ;;  %v3459_v4 = vld [vmem:[#allocation76_spill] sm:$0xff]  ;;  %v3460_v6 = vld [vmem:[#allocation81_spill] sm:$0xff] }
 0x20c   :  { %v3041_v57 = vpop.permute.xlu1 %1378  ;;  %vm710_vm6 = vcmp.eq.s32.totalorder %v3459_v4, 1  ;;  %vm802_vm9 = vcmp.eq.s32.totalorder %v3460_v6, 1  ;;  %vm1078_vm15 = vcmp.eq.s32.totalorder %v2801_v39, 1 }
 0x20d   :  { %v1500_v30 = vadd.f32 %v1494_v9, %v1408_v44  ;;  %v995_v44 = vsel %vm985_vm14, %v2857_v13, 0.0  ;;  %v266_v9 = vadd.f32 %v260_v63, %v174_v14  ;;  %v720_v17 = vsel %vm710_vm6, %v2836_v23, 0.0 }
 0x20e   :  { %v1001_v62 = vadd.f32 %v995_v44, %v909_v26  ;;  %vm1393_vm10 = vcmp.eq.s32.totalorder %v3041_v57, 1  ;;  %v812_v63 = vsel %vm802_vm9, %v2841_v35, 0.0  ;;  %v904_v23 = vsel %vm894_vm8, %v2845_v49, 0.0  ;;  %v3462_v35 = vld [vmem:[#allocation41_spill] sm:$0xff] }
 0x20f   :  { %v1506_v38 = vmul.f32 %v1500_v30, %v1460_v3  ;;  %v3068_v3 = vpop.permute.xlu0 %1295  ;;  %v444_v30 = vsel %vm434_vm1, %v2815_v60, 0.0  ;;  %v358_v2 = vadd.f32 %v352_v25, %v266_v9  ;;  %v1179_v60 = vsel %vm1169_vm4, %v2980_v56, 0.0 }
 0x210   :  { %v3045_v12 = vpop.permute.xlu1 %1114  ;;  %v1093_v40 = vadd.f32 %v1087_v22, %v1001_v62  ;;  %v1403_v44 = vsel %vm1393_vm10, %v3035_v21, 0.0  ;;  %v1363_v57 = vsel %vm1353_vm11, %v3006_v29, 0.0  ;;  %vm986_vm14 = vcmp.eq.s32.totalorder %v3462_v35, 1 }
 0x211   :  { %1512 = vadd.xlane.f32.xlu1 %v1506_v38  ;;  %v450_v48 = vadd.f32 %v444_v30, %v358_v2  ;;  %v1409_v22 = vadd.f32 %v1403_v44, %v1317_v53  ;;  %v996_v47 = vsel %vm986_vm14, %v2857_v13, 0.0  ;;  %v1088_v1 = vsel %vm1078_vm15, %v2861_v20, 0.0 }
 0x212   :  { %v1185_v42 = vadd.f32 %v1179_v60, %v1093_v40  ;;  %vm1262_vm1 = vcmp.eq.s32.totalorder %v2992_v15, 1  ;;  %vm1211_vm6 = vcmp.eq.s32.totalorder %v2973_v52, 1  ;;  %vm1121_vm10 = vcmp.eq.s32.totalorder %v3045_v12, 1  ;;  %v3466_v12 = vld [vmem:[#allocation54_spill] sm:$0xff] }
 0x213   :  { %v542_v45 = vadd.f32 %v536_v43, %v450_v48  ;;  %v3081_v31 = vpop.permute.xlu0 %1384  ;;  %vm1081_vm14 = vcmp.eq.s32.totalorder %v3466_v12, 1  ;;  %vm1213_vm15 = vcmp.eq.s32.totalorder %v3052_v5, 1 }
 0x214   :  { %v3054_v34 = vpop.permute.xlu1 %1203  ;;  %v1277_v26 = vadd.f32 %v1271_v11, %v1185_v42  ;;  %v1223_v5 = vsel %vm1213_vm15, %v2849_v55, 0.0 }
 0x215   :  { %v634_v27 = vadd.f32 %v628_v46, %v542_v45  ;;  %v3463_v46 = vld [vmem:[#allocation49_spill] sm:$0xff]  ;;  %v1272_v45 = vsel %vm1262_vm1, %v3002_v7, 0.0  ;;  %vm1212_vm8 = vcmp.eq.s32.totalorder %v3054_v34, 1 }
 0x216   :  { %v1369_v62 = vadd.f32 %v1363_v57, %v1277_v26  ;;  %vm1170_vm0 = vcmp.eq.s32.totalorder %v3463_v46, 1 }
 0x217   :  { %v726_v14 = vadd.f32 %v720_v17, %v634_v27  ;;  %v1474_v9 = vpop.permute.xlu0 %1473  ;;  %v1180_v13 = vsel %vm1170_vm0, %v2980_v56, 0.0  ;;  %v1312_v17 = vsel %vm1302_vm2, %v3016_v0, 0.0  ;;  %v3464_v27 = vld [vmem:[#allocation59_spill] sm:$0xff]  ;;  %vm1304_vm0 = vcmp.eq.s32.totalorder %v3068_v3, 1 }
 0x218   :  { %v3064_v24 = vpop.permute.xlu1 %1292  ;;  %vm1354_vm4 = vcmp.eq.s32.totalorder %v3464_v27, 1  ;;  %v1318_v8 = vadd.f32 %v1312_v17, %v2914_v37  ;;  %vm1486_vm5 = vcmp.eq.s32.totalorder %v1474_v9, 1  ;;  %v1221_v37 = vsel %vm1211_vm6, %v2849_v55, 0.0  ;;  %v3465_v9 = vld [vmem:[#allocation58_spill] sm:$0xff] }
 0x219   :  { %v818_v25 = vadd.f32 %v812_v63, %v726_v14  ;;  %vm1303_vm7 = vcmp.eq.s32.totalorder %v3064_v24, 1  ;;  %v1496_v14 = vsel %vm1486_vm5, %v3031_v59, 0.0  ;;  %vm1263_vm11 = vcmp.eq.s32.totalorder %v3465_v9, 1  ;;  %v24_v9 = vld [vmem:[%s3274_s1] sm:$0xff] }
 0x21a   :  { %v1313_v57 = vsel %vm1303_vm7, %v3016_v0, 0.0  ;;  %v1273_v35 = vsel %vm1263_vm11, %v3002_v7, 0.0  ;;  %v1314_v3 = vsel %vm1304_vm0, %v3016_v0, 0.0 }
 0x21b   :  { %v910_v30 = vadd.f32 %v904_v23, %v818_v25  ;;  %v3102_v48 = vpop.permute.xlu0 %1298  ;;  %v1227_v25 = vadd.f32 %v1221_v37, %v2899_v54 }
 0x21c   :  { %v1382_v38 = vpop.permute.xlu1 %1381 }
 0x21d   :  { %v1002_v4 = vadd.f32 %v996_v47, %v910_v30  ;;  %vm1394_vm3 = vcmp.eq.s32.totalorder %v1382_v38, 1  ;;  %v1364_v38 = vsel %vm1354_vm4, %v3006_v29, 0.0  ;;  %v3467_v47 = vld [vmem:[#allocation56_spill] sm:$0xff] }
 0x21e   :  { %v1404_v42 = vsel %vm1394_vm3, %v3035_v21, 0.0  ;;  %vm1172_vm2 = vcmp.eq.s32.totalorder %v3467_v47, 1  ;;  %vm1305_vm3 = vcmp.eq.s32.totalorder %v3102_v48, 1 }
 0x21f   :  { %v1094_v60 = vadd.f32 %v1088_v1, %v1002_v4  ;;  %v3111_v6 = vpop.permute.xlu0 %1387  ;;  %v1410_v58 = vadd.f32 %v1404_v42, %v1318_v8 }
 0x220   :  { %vm1396_vm4 = vcmp.eq.s32.totalorder %v3111_v6, 1 }
 0x221   :  { %v1431_v32 = vpop.permute.xlu1 %1430  ;;  %v1186_v11 = vadd.f32 %v1180_v13, %v1094_v60  ;;  %v1502_v23 = vadd.f32 %v1496_v14, %v1410_v58  ;;  %v1182_v60 = vsel %vm1172_vm2, %v2980_v56, 0.0  ;;  %v1406_v13 = vsel %vm1396_vm4, %v3035_v21, 0.0 }
 0x222   :  { %vm1445_vm12 = vcmp.eq.s32.totalorder %v1431_v32, 1  ;;  %vm1650_vm4 = vcmask 7168  }
 0x223   :  { %v1455_v51 = vsel %vm1445_vm12, %v3022_v36, 0.0  ;;  %v1278_v15 = vadd.f32 %v1272_v45, %v1186_v11  ;;  %v1477_v63 = vpop.permute.xlu0 %1476  ;;  %vm1395_vm12 = vcmp.eq.s32.totalorder %v3081_v31, 1  ;;  %v1188_v11 = vadd.f32 %v1182_v60, %v2976_v61 }
 0x224   :  { %v1461_v49 = vadd.f32 %v1455_v51, %v1369_v62  ;;  %v1319_v62 = vadd.f32 %v1313_v57, %v1227_v25  ;;  %v1405_v54 = vsel %vm1395_vm12, %v3035_v21, 0.0  ;;  %vm1487_vm1 = vcmp.eq.s32.totalorder %v1477_v63, 1 }
 0x225   :  { %v1370_v26 = vadd.f32 %v1364_v38, %v1278_v15 }
 0x226   :  { %v1471_v16 = vpop.permute.xlu1 %1470 }
 0x227   :  { %vm1485_vm13 = vcmp.eq.s32.totalorder %v1471_v16, 1  ;;  %v1391_v51 = vpop.permute.xlu0 %1390  ;;  %v1131_v16 = vsel %vm1121_vm10, %v2794_v19, 0.0 }
 0x228   :  { %v1495_v2 = vsel %vm1485_vm13, %v3031_v59, 0.0  ;;  %v1137_v31 = vadd.f32 %v1131_v16, %v2710_v50  ;;  %vm1397_vm10 = vcmp.eq.s32.totalorder %v1391_v51, 1  ;;  %v28_v51 = vld [vmem:[%s3274_s1 + $0x20] sm:$0xff]  ;;  %v29_v16 = vld [vmem:[%s3274_s1 + $0x28] sm:$0xff] }
 0x229   :  { %v1501_v33 = vadd.f32 %v1495_v2, %v1409_v22  ;;  %v1222_v22 = vsel %vm1212_vm8, %v2849_v55, 0.0  ;;  %v1091_v2 = vsel %vm1081_vm14, %v2861_v20, 0.0  ;;  %v1497_v20 = vsel %vm1487_vm1, %v3031_v59, 0.0 }
 0x22a   :  { %v1228_v19 = vadd.f32 %v1222_v22, %v2892_v41  ;;  %v1097_v17 = vadd.f32 %v1091_v2, %v2963_v28  ;;  %v1407_v61 = vsel %vm1397_vm10, %v3035_v21, 0.0 }
 0x22b   :  { %v3100_v43 = vpop.permute.xlu1 %1166  ;;  %v1507_v40 = vmul.f32 %v1501_v33, %v1461_v49  ;;  %v1411_v49 = vadd.f32 %v1405_v54, %v1319_v62  ;;  %v1279_v33 = vadd.f32 %v1273_v35, %v2988_v10  ;;  %v1480_v50 = vpop.permute.xlu0 %1479 }
 0x22c   :  { %v1320_v10 = vadd.f32 %v1314_v3, %v1228_v19  ;;  %vm1173_vm7 = vcmp.eq.s32.totalorder %v3100_v43, 1  ;;  %vm1488_vm11 = vcmp.eq.s32.totalorder %v1480_v50, 1 }
 0x22d   :  { %1514 = vadd.xlane.f32.xlu0 %v1507_v40  ;;  %v1229_v40 = vadd.f32 %v1223_v5, %v1137_v31  ;;  %v1503_v46 = vadd.f32 %v1497_v20, %v1411_v49  ;;  %v1183_v42 = vsel %vm1173_vm7, %v2980_v56, 0.0  ;;  %v1498_v28 = vsel %vm1488_vm11, %v3031_v59, 0.0 }
 0x22e   :  { %v1189_v38 = vadd.f32 %v1183_v42, %v1097_v17 }
 0x22f   :  { %v3106_v39 = vpop.permute.xlu1 %1255  ;;  %v1483_v27 = vpop.permute.xlu0 %1482 }
 0x230   :  { %vm1264_vm5 = vcmp.eq.s32.totalorder %v3106_v39, 1  ;;  %v1315_v39 = vsel %vm1305_vm3, %v3016_v0, 0.0  ;;  %v1412_v0 = vadd.f32 %v1406_v13, %v1320_v10  ;;  %vm1489_vm14 = vcmp.eq.s32.totalorder %v1483_v27, 1 }
 0x231   :  { %v1274_v45 = vsel %vm1264_vm5, %v3002_v7, 0.0  ;;  %v1321_v48 = vadd.f32 %v1315_v39, %v1229_v40  ;;  %v1499_v21 = vsel %vm1489_vm14, %v3031_v59, 0.0  ;;  %v27_v59 = vld [vmem:[%s3274_s1 + $0x18] sm:$0xff] }
 0x232   :  { %v1280_v15 = vadd.f32 %v1274_v45, %v1188_v11 }
 0x233   :  { %v1345_v32 = vpop.permute.xlu1 %1344 }
 0x234   :  { %vm1355_vm13 = vcmp.eq.s32.totalorder %v1345_v32, 1 }
 0x235   :  { %v1365_v30 = vsel %vm1355_vm13, %v3006_v29, 0.0 }
 0x236   :  { %v1371_v41 = vadd.f32 %v1365_v30, %v1279_v33 }
 0x237   :  { %v1434_v18 = vpop.permute.xlu1 %1433 }
 0x238   :  { %vm1446_vm9 = vcmp.eq.s32.totalorder %v1434_v18, 1 }
 0x239   :  { %v1456_v44 = vsel %vm1446_vm9, %v3022_v36, 0.0 }
 0x23a   :  { %v1462_v53 = vadd.f32 %v1456_v44, %v1370_v26  ;;  %v1504_v44 = vadd.f32 %v1498_v28, %v1412_v0 }
 0x23b   :  { %v1259_v52 = vpop.permute.xlu1 %1258 }
 0x23c   :  { %v1508_v24 = vmul.f32 %v1502_v23, %v1462_v53  ;;  %vm1265_vm8 = vcmp.eq.s32.totalorder %v1259_v52, 1  ;;  %v1413_v23 = vadd.f32 %v1407_v61, %v1321_v48 }
 0x23d   :  { %v1275_v8 = vsel %vm1265_vm8, %v3002_v7, 0.0 }
 0x23e   :  { %1516 = vadd.xlane.f32.xlu0 %v1508_v24  ;;  %v1281_v26 = vadd.f32 %v1275_v8, %v1189_v38  ;;  %v1505_v25 = vadd.f32 %v1499_v21, %v1413_v23 }
 0x23f   :  { %v1348_v34 = vpop.permute.xlu1 %1347 }
 0x240   :  { %vm1356_vm9 = vcmp.eq.s32.totalorder %v1348_v34, 1 }
 0x241   :  { %v1366_v32 = vsel %vm1356_vm9, %v3006_v29, 0.0 }
 0x242   :  { %v1372_v18 = vadd.f32 %v1366_v32, %v1280_v15 }
 0x243   :  { %v1437_v1 = vpop.permute.xlu1 %1436 }
 0x244   :  { %vm1447_vm6 = vcmp.eq.s32.totalorder %v1437_v1, 1 }
 0x245   :  { %v1457_v4 = vsel %vm1447_vm6, %v3022_v36, 0.0 }
 0x246   :  { %v1463_v55 = vadd.f32 %v1457_v4, %v1371_v41 }
 0x247   :  { %v1351_v6 = vpop.permute.xlu1 %1350 }
 0x248   :  { %v1509_v43 = vmul.f32 %v1503_v46, %v1463_v55  ;;  %vm1357_vm12 = vcmp.eq.s32.totalorder %v1351_v6, 1 }
 0x249   :  { %v1367_v56 = vsel %vm1357_vm12, %v3006_v29, 0.0  ;;  %v25_v29 = vld [vmem:[%s3274_s1 + $0x8] sm:$0xff] }
 0x24a   :  { %1518 = vadd.xlane.f32.xlu1 %v1509_v43  ;;  %v1373_v53 = vadd.f32 %v1367_v56, %v1281_v26 }
 0x24b   :  { %v1440_v58 = vpop.permute.xlu1 %1439 }
 0x24c   :  { %vm1448_vm13 = vcmp.eq.s32.totalorder %v1440_v58, 1 }
 0x24d   :  { %v1458_v63 = vsel %vm1448_vm13, %v3022_v36, 0.0 }
 0x24e   :  { %v1464_v14 = vadd.f32 %v1458_v63, %v1372_v18 }
 0x24f   :  { %v1443_v7 = vpop.permute.xlu1 %1442 }
 0x250   :  { %vm1449_vm15 = vcmp.eq.s32.totalorder %v1443_v7, 1  ;;  %v1510_v37 = vmul.f32 %v1504_v44, %v1464_v14 }
 0x251   :  { %v1459_v57 = vsel %vm1449_vm15, %v3022_v36, 0.0  ;;  %v26_v36 = vld [vmem:[%s3274_s1 + $0x10] sm:$0xff]  ;;  %s1811_s1 = smov [#allocation2]  }
 0x252   :  { %v1465_v52 = vadd.f32 %v1459_v57, %v1373_v53  ;;  %1520 = vadd.xlane.f32.xlu0 %v1510_v37  ;;  %s1687_s5 = sshll.u32 %s1811_s1, 4  ;;  %s1688_s5 = int_to_ptr.vmem [resolvable:$true] %s1687_s5 }
 0x253   :  { %s1784_s7 = scalar_lea.vmem %s1688_s5, 128  ;;  %p1789_p1 = scmp.lt.s32.totalorder %s1688_s5, %s1688_s5 }
 0x254   :  { %v1511_v24 = vmul.f32 %v1505_v25, %v1465_v52  ;;  %p1785_p0 = scmp.ne.s32.totalorder %s1688_s5, %s1784_s7  ;;  %p1790_p2 = scmp.lt.s32.totalorder %s1784_s7, %s1784_s7 }
 0x256   :  { %1522 = vadd.xlane.f32.xlu1 %v1511_v24  ;;  %p1791_p3 = por %p1790_p2, %p1789_p1 }
 0x258   :  { %p1792_p4 = pnand %p1791_p3, %p1785_p0 }
 0x267   :  { %1628 = vrot.lane.b32.xlu1 %v25_v29, %s1810_s22 }
 0x268   :  { %1626 = vrot.lane.b32.xlu0 %v24_v9, %s1810_s22 }
 0x26b   :  { %1630 = vrot.lane.b32.xlu1 %v26_v36, %s1810_s22 }
 0x26c   :  { %1632 = vrot.lane.b32.xlu0 %v27_v59, %s1810_s22 }
 0x26f   :  { %1634 = vrot.lane.b32.xlu1 %v28_v51, %s1810_s22 }
 0x270   :  { %1636 = vrot.lane.b32.xlu0 %v29_v16, %s1810_s22 }
 0x29e   :  { %v1513_v22 = vpop.xlane.xlu1 %1512 }
 0x29f   :  { %v3189_v12 = vmul.f32 %v1513_v22, %v24_v9 }
 0x2a1   :  { %v1530_v35 = vand.u32 2147483647, %v3189_v12 }
 0x2a3   :  { %v1536_v31 = vsub.f32 0.0, %v1530_v35 }
 0x2a5   :  { %v1542_v30 = vmul.f32 1.442695, %v1536_v31 }
 0x2a7   :  { %1742 = vpow2.f32 %v1542_v30 }
 0x2b1   :  { %v3200_v41 = vpop.eup %1742 }
 0x2b2   :  { %v3206_v4 = vadd.f32 1.0, %v3200_v41 }
 0x2b4   :  { %v1695_v6 = vadd.f32 -1.0, %v3206_v4  ;;  %vm1560_vm2 = vcmp.eq.f32.partialorder %v3206_v4, 1.0 }
 0x2ba   :  { %v1515_v62 = vpop.xlane.xlu0 %1514 }
 0x2bb   :  { %v3191_v34 = vmul.f32 %v1515_v62, %v25_v29 }
 0x2bd   :  { %v1531_v54 = vand.u32 2147483647, %v3191_v34 }
 0x2bf   :  { %v1537_v19 = vsub.f32 0.0, %v1531_v54 }
 0x2c1   :  { %v1544_v33 = vmul.f32 1.442695, %v1537_v19 }
 0x2c3   :  { %1744 = vpow2.f32 %v1544_v33 }
 0x2cb   :  { %v1517_v2 = vpop.xlane.xlu0 %1516 }
 0x2cc   :  { %v3195_v49 = vmul.f32 %v1517_v2, %v26_v36  ;;  %v1609_v2 = vmin.f32 %v3191_v34, 0.0 }
 0x2cd   :  { %v3203_v40 = vpop.eup %1744 }
 0x2ce   :  { %v1532_v47 = vand.u32 2147483647, %v3195_v49  ;;  %v3211_v60 = vadd.f32 1.0, %v3203_v40  ;;  %v1610_v33 = vmin.f32 %v3195_v49, 0.0 }
 0x2d0   :  { %v1538_v5 = vsub.f32 0.0, %v1532_v47  ;;  %v1696_v43 = vadd.f32 -1.0, %v3211_v60  ;;  %vm1561_vm0 = vcmp.eq.f32.partialorder %v3211_v60, 1.0 }
 0x2d2   :  { %v1546_v3 = vmul.f32 1.442695, %v1538_v5 }
 0x2d4   :  { %1746 = vpow2.f32 %v1546_v3 }
 0x2d7   :  { %v1519_v1 = vpop.xlane.xlu1 %1518 }
 0x2d8   :  { %v3198_v50 = vmul.f32 %v1519_v1, %v27_v59 }
 0x2da   :  { %v1533_v20 = vand.u32 2147483647, %v3198_v50 }
 0x2dc   :  { %v1539_v10 = vsub.f32 0.0, %v1533_v20  ;;  %v1608_v20 = vmin.f32 %v3189_v12, 0.0 }
 0x2de   :  { %v3208_v55 = vpop.eup %1746  ;;  %v1548_v46 = vmul.f32 1.442695, %v1539_v10  ;;  %v1611_v10 = vmin.f32 %v3198_v50, 0.0 }
 0x2df   :  { %v1521_v39 = vpop.xlane.xlu0 %1520  ;;  %v1556_v13 = vadd.f32 1.0, %v3208_v55 }
 0x2e0   :  { %1748 = vpow2.f32 %v1548_v46  ;;  %v3214_v45 = vmul.f32 %v1521_v39, %v28_v51 }
 0x2e1   :  { %v1697_v42 = vadd.f32 -1.0, %v1556_v13  ;;  %1750 = vrcp.f32 %v1695_v6  ;;  %vm1562_vm1 = vcmp.eq.f32.partialorder %v1556_v13, 1.0 }
 0x2e2   :  { %v1534_v11 = vand.u32 2147483647, %v3214_v45  ;;  %1752 = vlog2.f32 %v3211_v60  ;;  %v1612_v12 = vmin.f32 %v3214_v45, 0.0 }
 0x2e3   :  { %v1523_v17 = vpop.xlane.xlu1 %1522  ;;  %1754 = vrcp.f32 %v1696_v43  ;;  %v1627_v5 = vpop.permute.xlu0 %1626 }
 0x2e4   :  { %v1540_v32 = vsub.f32 0.0, %v1534_v11  ;;  %v3219_v27 = vmul.f32 %v1523_v17, %v29_v16  ;;  %1756 = vrcp.f32 %v1697_v42 }
 0x2e6   :  { %v1550_v48 = vmul.f32 1.442695, %v1540_v32  ;;  %v1535_v0 = vand.u32 2147483647, %v3219_v27 }
 0x2e7   :  { %v1629_v54 = vpop.permute.xlu1 %1628  ;;  %v1633_v49 = vpop.permute.xlu0 %1632 }
 0x2e8   :  { %1758 = vpow2.f32 %v1550_v48  ;;  %v1541_v15 = vsub.f32 0.0, %v1535_v0 }
 0x2e9   :  { %1760 = vlog2.f32 %v1556_v13 }
 0x2ea   :  { %v1749_v8 = vpop.eup %1748  ;;  %v1552_v58 = vmul.f32 1.442695, %v1541_v15  ;;  %1762 = vlog2.f32 %v3206_v4 }
 0x2eb   :  { %v1557_v61 = vadd.f32 1.0, %v1749_v8  ;;  %v1751_v18 = vpop.eup %1750 }
 0x2ec   :  { %1764 = vpow2.f32 %v1552_v58  ;;  %v1753_v28 = vpop.eup %1752  ;;  %v1585_v57 = vmul.f32 %v1751_v18, %v3200_v41 }
 0x2ed   :  { %1766 = vlog2.f32 %v1557_v61  ;;  %v1698_v38 = vadd.f32 -1.0, %v1557_v61  ;;  %v1755_v56 = vpop.eup %1754  ;;  %v1569_v52 = vmul.f32 0.6931472, %v1753_v28  ;;  %vm1563_vm3 = vcmp.eq.f32.partialorder %v1557_v61, 1.0 }
 0x2ee   :  { %v1757_v63 = vpop.eup %1756  ;;  %v1587_v23 = vmul.f32 %v1755_v56, %v3203_v40  ;;  %v1613_v56 = vmin.f32 %v3219_v27, 0.0 }
 0x2ef   :  { %1768 = vrcp.f32 %v1698_v38  ;;  %v1589_v7 = vmul.f32 %v1757_v63, %v3208_v55 }
 0x2f0   :  { %v1597_v36 = vmul.f32 %v1587_v23, %v1569_v52 }
 0x2f2   :  { %v3224_v26 = vpop.eup %1758  ;;  %v1603_v31 = vsel %vm1561_vm0, %v3203_v40, %v1597_v36 }
 0x2f3   :  { %v1761_v14 = vpop.eup %1760  ;;  %v1558_v44 = vadd.f32 1.0, %v3224_v26  ;;  %v1615_v40 = vsub.f32 %v1609_v2, %v1603_v31 }
 0x2f4   :  { %v1763_v53 = vpop.eup %1762  ;;  %v1571_v25 = vmul.f32 0.6931472, %v1761_v14 }
 0x2f5   :  { %1770 = vlog2.f32 %v1558_v44  ;;  %v1699_v37 = vadd.f32 -1.0, %v1558_v44  ;;  %v1567_v9 = vmul.f32 0.6931472, %v1763_v53  ;;  %v1645_v34 = vmul.f32 %v1629_v54, %v1615_v40 }
 0x2f6   :  { %v3229_v21 = vpop.eup %1764  ;;  %v1598_v59 = vmul.f32 %v1589_v7, %v1571_v25  ;;  %vm1564_vm5 = vcmp.eq.f32.partialorder %v1558_v44, 1.0  ;;  %v1637_v44 = vpop.permute.xlu0 %1636 }
 0x2f7   :  { %v1767_v24 = vpop.eup %1766  ;;  %1772 = vrcp.f32 %v1699_v37  ;;  %v3233_v29 = vadd.f32 1.0, %v3229_v21  ;;  %v1596_v22 = vmul.f32 %v1585_v57, %v1567_v9  ;;  %v1652_v50 = vsel %vm1650_vm4, %v1645_v34, 0.0 }
 0x2f8   :  { %v1573_v62 = vmul.f32 0.6931472, %v1767_v24  ;;  %v1604_v19 = vsel %vm1562_vm1, %v3208_v55, %v1598_v59  ;;  %v1631_v55 = vpop.permute.xlu1 %1630 }
 0x2f9   :  { %v1769_v51 = vpop.eup %1768  ;;  %1774 = vlog2.f32 %v3233_v29  ;;  %v1700_v16 = vadd.f32 -1.0, %v3233_v29  ;;  %v1602_v47 = vsel %vm1560_vm2, %v3200_v41, %v1596_v22  ;;  %v1616_v46 = vsub.f32 %v1610_v33, %v1604_v19  ;;  %v3469_v22 = vld [vmem:[#allocation9_spill] sm:$0xff] }
 0x2fa   :  { %v1591_v35 = vmul.f32 %v1769_v51, %v1749_v8  ;;  %v1614_v39 = vsub.f32 %v1608_v20, %v1602_v47  ;;  %vm1565_vm6 = vcmp.eq.f32.partialorder %v3233_v29, 1.0  ;;  %vm1675_vm7 = vcmp.eq.s32.totalorder %v3469_v22, 0 }
 0x2fb   :  { %1776 = vrcp.f32 %v1700_v16  ;;  %v1646_v43 = vmul.f32 %v1631_v55, %v1616_v46 }
 0x2fc   :  { %v1599_v30 = vmul.f32 %v1591_v35, %v1573_v62  ;;  %v1644_v41 = vmul.f32 %v1627_v5, %v1614_v39  ;;  %v1635_v48 = vpop.permute.xlu1 %1634 }
 0x2fd   :  { %v1654_v61 = vsel %vm1650_vm4, %v1646_v43, 0.0 }
 0x2fe   :  { %v1605_v3 = vsel %vm1563_vm3, %v1749_v8, %v1599_v30  ;;  %v1651_v58 = vsel %vm1650_vm4, %v1644_v41, 0.0 }
 0x2ff   :  { %v1771_v1 = vpop.eup %1770  ;;  %v1617_v13 = vsub.f32 %v1611_v10, %v1605_v3  ;;  %v1653_v18 = vadd.f32 %v1652_v50, %v1651_v58 }
 0x300   :  { %v1575_v6 = vmul.f32 0.6931472, %v1771_v1 }
 0x301   :  { %v1773_v60 = vpop.eup %1772  ;;  %v1647_v32 = vmul.f32 %v1633_v49, %v1617_v13  ;;  %v1655_v14 = vadd.f32 %v1654_v61, %v1653_v18 }
 0x302   :  { %v1593_v4 = vmul.f32 %v1773_v60, %v3224_v26 }
 0x303   :  { %v1775_v11 = vpop.eup %1774  ;;  %v1656_v45 = vsel %vm1650_vm4, %v1647_v32, 0.0 }
 0x304   :  { %v1600_v17 = vmul.f32 %v1593_v4, %v1575_v6  ;;  %v1577_v15 = vmul.f32 0.6931472, %v1775_v11  ;;  %v1657_v53 = vadd.f32 %v1656_v45, %v1655_v14 }
 0x305   :  { %v1777_v42 = vpop.eup %1776 }
 0x306   :  { %v1606_v0 = vsel %vm1564_vm5, %v3224_v26, %v1600_v17  ;;  %v1595_v8 = vmul.f32 %v1777_v42, %v3229_v21 }
 0x307   :  { %v1618_v38 = vsub.f32 %v1612_v12, %v1606_v0 }
 0x308   :  { %v1601_v28 = vmul.f32 %v1595_v8, %v1577_v15 }
 0x309   :  { %v1648_v63 = vmul.f32 %v1635_v48, %v1618_v38 }
 0x30a   :  { %v1607_v26 = vsel %vm1565_vm6, %v3229_v21, %v1601_v28  ;;  %v3468_v21 = vlaneseq }
 0x30b   :  { %v1658_v23 = vsel %vm1650_vm4, %v1648_v63, 0.0  ;;  %v1619_v7 = vsub.f32 %v1613_v56, %v1607_v26 }
 0x30c   :  { %v1659_v57 = vadd.f32 %v1658_v23, %v1657_v53  ;;  %v1674_v16 = vand.u32 127, %v3468_v21 }
 0x30d   :  { %v1649_v37 = vmul.f32 %v1637_v44, %v1619_v7 }
 0x30e   :  { %vm1676_vm9 = vcmp.eq.s32.totalorder %v1674_v16, 0 }
 0x30f   :  { %v1660_v52 = vsel %vm1650_vm4, %v1649_v37, 0.0  ;;  %vm1677_vm10 = vmand %vm1675_vm7, %vm1676_vm9 }
 0x310   :  { %v1661_v25 = vadd.f32 %v1660_v52, %v1659_v57 }
 0x312   :  { %1662 = vadd.xlane.f32.xlu1 %v1661_v25 }
 0x39f   :  { %v1663_v27 = vpop.xlane.xlu1 %1662 }
 0x3a0   :  { %v1664_v24 = vrot.slane %v1663_v27, 4 }
 0x3a2   :  { %v1665_v9 = vadd.f32 %v1664_v24, %v1663_v27 }
 0x3a4   :  { %v1666_v36 = vrot.slane %v1665_v9, 2 }
 0x3a6   :  { %v1667_v59 = vadd.f32 %v1666_v36, %v1665_v9 }
 0x3a8   :  { %v1668_v29 = vrot.slane %v1667_v59, 1 }
 0x3aa   :  { %v1669_v51 = vadd.f32 %v1668_v29, %v1667_v59 }
 0x3ac   :  { %1701 = vpush %v1669_v51 }
 0x3dd   :  { %s1702_s6 = spop %1701 }
 0x3de   :  { %v1678_v62 = vstv %s1702_s6 }
 0x3df   :  { %v1679_v35 = vsel %vm1677_vm10, %v1678_v62, 0.0 }
 0x3e0   :  { %1680 = vst [vmem:[#allocation2] sm:$0xff] %v1679_v35 }
 0x3e1   :  { %1795 = shalt.err (!%p1792_p4)
}
 0x3e2   :  { %s1796_s10 = scalar_lea.hbm %s3277_s4, 128 }
 0x3e3   :  { %p1797_p5 = scmp.ne.s32.totalorder %s3277_s4, %s1796_s10  ;;  %p1800_p6 = scmp.lt.u32.totalorder %s1796_s10, %s3277_s4 }
 0x3e5   :  { %p1802_p7 = pnand %p1800_p6, %p1797_p5 }
 0x3e7   :  { %1805 = shalt.err (!%p1802_p7)
}
 0x3e8   :  { %1690 = dma.vmem_to_hbm [thread:$0]  %s1688_s5, 128, %s3277_s4, [#allocation3]  }
 0x3e9   :  { %1806 = dma.done.wait [#allocation3], 128  }
 0x3ea   :  { %1807 = vsyncadd [#allocation3], 4294967168 }
 0x3eb   :  { %1694 = vsyncpa [#allocation3], 1 }

</bundles_post_ra>
